<compile_context>
chip_gen: v6e
topology: v6e:2x2x1
jax: 0.10.0
libtpu: 0.0.40
codegen_flags: <defaults>
</compile_context>

<pallas_src>
import functools

import numpy as np
import jax
import jax.numpy as jnp
from jax import lax
from jax.experimental import pallas as pl
from jax.experimental.pallas import tpu as pltpu


# ----------------------------------------------------------------------------
# In-kernel math helpers
# ----------------------------------------------------------------------------
_SQRT_HALF = 0.7071067811865476


def _erf_approx(x):
    # Abramowitz & Stegun 7.1.26 rational approximation (|err| <= 1.5e-7).
    p = 0.3275911
    a1, a2, a3, a4, a5 = (0.254829592, -0.284496736, 1.421413741,
                          -1.453152027, 1.061405429)
    ax = jnp.abs(x)
    t = 1.0 / (1.0 + p * ax)
    poly = ((((a5 * t + a4) * t + a3) * t + a2) * t + a1) * t
    y = 1.0 - poly * jnp.exp(-(ax * ax))
    return jnp.where(x < 0.0, -y, y)


def _gelu_exact(x):
    # nn.GELU() default = erf formulation (approximated above), slab-wise in f32
    return 0.5 * x * (1.0 + _erf_approx(x * _SQRT_HALF))


# ----------------------------------------------------------------------------
# Pallas kernel 1: Inception(d_model->d_ff) -> GELU -> Inception(d_ff->d_model)
# One grid step = one batch element.  All matmuls are [L, C] slabs (M = image).
# ----------------------------------------------------------------------------
def conv_stack_kernel(x_ref, w1_ref, b1_ref, w2_ref, b2_ref, out_ref,
                      midf_ref, *, H, W, Wp, L, num_kernels, pmax):
    Cff = w1_ref.shape[-1]
    Cout = w2_ref.shape[-1]
    base = pmax * Wp + pmax            # flat offset of output position (0, 0)

    # ---- Inception block 1 (Cin -> Cff): per-tap slab matmuls, M = L -------
    acc1 = jnp.zeros((L, Cff), jnp.float32)
    tap = 0
    for kk in range(num_kernels):
        r = kk                                             # kernel radius
        for di in range(-r, r + 1):
            for dj in range(-r, r + 1):
                start = base + di * Wp + dj                # always in [0, Hp*Wp-L]
                lhs = x_ref[0, pl.ds(start, L), :]         # [L, Cin], 2-D slice
                acc1 = acc1 + jnp.dot(lhs, w1_ref[tap],
                                      preferred_element_type=jnp.float32)
                tap += 1
    acc1 = acc1 + b1_ref[...]                              # mean bias
    mid = _gelu_exact(acc1)                                # [L, Cff] f32

    # Zero what layer 2's "same" padding must see as zero:
    #   (a) the junk columns inside the L range (they land in the W padding),
    #   (b) the two untouched end regions of the padded flat scratch.
    if pmax > 0:
        col = (lax.broadcasted_iota(jnp.int32, (L, 1), 0) + base) % Wp
        keep = jnp.logical_and(col >= pmax, col < pmax + W)
        mid = jnp.where(keep, mid, 0.0)
        midf_ref[pl.ds(0, base), :] = jnp.zeros((base, Cff), jnp.float32)
        midf_ref[pl.ds(base + L, base), :] = jnp.zeros((base, Cff), jnp.float32)
    midf_ref[pl.ds(base, L), :] = mid                      # one slab store

    # ---- Inception block 2 (Cff -> Cout) -----------------------------------
    acc2 = jnp.zeros((L, Cout), jnp.float32)
    tap = 0
    for kk in range(num_kernels):
        r = kk
        for di in range(-r, r + 1):
            for dj in range(-r, r + 1):
                start = base + di * Wp + dj
                lhs = midf_ref[pl.ds(start, L), :]         # [L, Cff]
                acc2 = acc2 + jnp.dot(lhs, w2_ref[tap],
                                      preferred_element_type=jnp.float32)
                tap += 1
    out_ref[0] = (acc2 + b2_ref[...]).astype(out_ref.dtype)   # one slab store


def inception_stack(x_nhwc, params, num_kernels):
    """Inception(d_model->d_ff) + GELU + Inception(d_ff->d_model) via Pallas."""
    B, H, W, Cin = x_nhwc.shape
    Cff = params["w1"].shape[-1]
    Cout = params["w2"].shape[-1]
    pmax = num_kernels - 1
    Hp, Wp = H + 2 * pmax, W + 2 * pmax
    L = (H - 1) * Wp + W                       # contiguous flat output range
    T1 = params["w1"].shape[0]

    # Fold the 1/num_kernels "mean over kernel sizes" into the weights once.
    inv_nk = 1.0 / float(num_kernels)
    w1 = (params["w1"] * inv_nk).astype(jnp.float32)
    w2 = (params["w2"] * inv_nk).astype(jnp.float32)

    xpad = jnp.pad(x_nhwc, ((0, 0), (pmax, pmax), (pmax, pmax), (0, 0)))
    x_flat = xpad.reshape(B, Hp * Wp, Cin)

    kernel = functools.partial(conv_stack_kernel, H=H, W=W, Wp=Wp, L=L,
                               num_kernels=num_kernels, pmax=pmax)
    out_flat = pl.pallas_call(
        kernel,
        out_shape=jax.ShapeDtypeStruct((B, L, Cout), x_nhwc.dtype),
        grid=(B,),
        in_specs=[
            pl.BlockSpec((1, Hp * Wp, Cin), lambda b: (b, 0, 0)),
            pl.BlockSpec((T1, Cin, Cff), lambda b: (0, 0, 0)),
            pl.BlockSpec((1, Cff), lambda b: (0, 0)),
            pl.BlockSpec((T1, Cff, Cout), lambda b: (0, 0, 0)),
            pl.BlockSpec((1, Cout), lambda b: (0, 0)),
        ],
        out_specs=pl.BlockSpec((1, L, Cout), lambda b: (b, 0, 0)),
        scratch_shapes=[pltpu.VMEM((Hp * Wp, Cff), jnp.float32)],
        compiler_params=pltpu.CompilerParams(dimension_semantics=("parallel",)),
    )(x_flat, w1, params["b1"], w2, params["b2"])

    # Un-flatten: valid output position (h, w) lives at local row h*Wp + w.
    pad_rows = H * Wp - L                      # = 2*pmax
    if pad_rows:
        out_flat = jnp.pad(out_flat, ((0, 0), (0, pad_rows), (0, 0)))
    return out_flat.reshape(B, H, Wp, Cout)[:, :, :W, :]


# ----------------------------------------------------------------------------
# Pallas kernel 2: weighted aggregation over the k period branches + residual.
# Period weights come in via SMEM; data is flattened to a lane-dense (T*N) dim.
# ----------------------------------------------------------------------------
def agg_kernel(x_ref, res_ref, pw_ref, out_ref, *, K):
    b = pl.program_id(0)
    acc = x_ref[0].astype(jnp.float32)                     # [1, T*N]
    for kk in range(K):
        acc = acc + res_ref[kk, 0].astype(jnp.float32) * pw_ref[b, kk]
    out_ref[0] = acc.astype(out_ref.dtype)


def weighted_aggregate(x, res_stack, pw):
    B, T, N = x.shape
    K = res_stack.shape[0]
    x2 = x.reshape(B, 1, T * N)
    res2 = res_stack.reshape(K, B, 1, T * N)
    out = pl.pallas_call(
        functools.partial(agg_kernel, K=K),
        out_shape=jax.ShapeDtypeStruct((B, 1, T * N), x.dtype),
        grid=(B,),
        in_specs=[
            pl.BlockSpec((1, 1, T * N), lambda b: (b, 0, 0)),
            pl.BlockSpec((K, 1, 1, T * N), lambda b: (0, b, 0, 0)),
            pl.BlockSpec(memory_space=pltpu.MemorySpace.SMEM),   # [B, K] weights
        ],
        out_specs=pl.BlockSpec((1, 1, T * N), lambda b: (b, 0, 0)),
        compiler_params=pltpu.CompilerParams(dimension_semantics=("parallel",)),
    )(x2, res2, pw.astype(jnp.float32))
    return out.reshape(B, T, N)


# ----------------------------------------------------------------------------
# Glue: FFT_for_Period (data-dependent -> must produce concrete periods)
# ----------------------------------------------------------------------------
def fft_for_period(x, k):
    T = x.shape[1]
    xf = jnp.fft.rfft(x.astype(jnp.float32), axis=1)
    amp = jnp.abs(xf)                                   # [B, T//2+1, N]
    freq = amp.mean(axis=0).mean(axis=-1)               # [T//2+1]
    freq = freq.at[0].set(0.0)
    _, top_idx = jax.lax.top_k(freq, k)
    top_idx = np.asarray(jax.device_get(top_idx))       # host sync (see TODO above)
    safe_idx = np.maximum(top_idx, 1)                   # guard div-by-zero degenerate case
    periods = (T // safe_idx).astype(np.int64)          # concrete python-side ints
    period_weight = amp.mean(axis=-1)[:, top_idx]       # [B, k]
    return periods, period_weight


# ----------------------------------------------------------------------------
# TimesBlock forward (Pallas path)
# ----------------------------------------------------------------------------
def timesblock_forward(x, params, *, seq_len, pred_len, top_k, num_kernels):
    B, T, N = x.shape
    total = seq_len + pred_len
    assert total == T, "TimesBlock expects T == seq_len + pred_len"

    periods, period_weight = fft_for_period(x, top_k)

    res = []
    for i in range(top_k):
        p = int(periods[i])
        if total % p != 0:
            length = (total // p + 1) * p
            pad = jnp.zeros((B, length - total, N), x.dtype)
            out = jnp.concatenate([x, pad], axis=1)
        else:
            length = total
            out = x
        out = out.reshape(B, length // p, p, N)          # NHWC
        out = inception_stack(out, params, num_kernels)  # Pallas conv stack
        out = out.reshape(B, length, N)[:, :total, :]
        res.append(out)
    res_stack = jnp.stack(res, axis=0)                   # [k, B, T, N]

    pw = jax.nn.softmax(period_weight, axis=1)           # [B, k]
    return weighted_aggregate(x, res_stack, pw)          # Pallas aggregation + residual


# ----------------------------------------------------------------------------
# Deterministic parameter init (same shapes as the PyTorch module's __init__)
# ----------------------------------------------------------------------------
def init_params(key, d_model, d_ff, num_kernels):
    k1, k2, k3, k4 = jax.random.split(key, 4)
    w1_list, w2_list = [], []
    for kk in range(num_kernels):
        ks = 2 * kk + 1
        std1 = (2.0 / (d_ff * ks * ks)) ** 0.5
        std2 = (2.0 / (d_model * ks * ks)) ** 0.5
        w1_list.append(jax.random.normal(jax.random.fold_in(k1, kk),
                                         (ks * ks, d_model, d_ff), jnp.float32) * std1)
        w2_list.append(jax.random.normal(jax.random.fold_in(k2, kk),
                                         (ks * ks, d_ff, d_model), jnp.float32) * std2)
    w1 = jnp.concatenate(w1_list, axis=0)            # [sum ks^2, d_model, d_ff]
    w2 = jnp.concatenate(w2_list, axis=0)            # [sum ks^2, d_ff, d_model]
    b1_all = jax.random.normal(k3, (num_kernels, d_ff), jnp.float32) * 0.02
    b2_all = jax.random.normal(k4, (num_kernels, d_model), jnp.float32) * 0.02
    return dict(w1=w1, b1=b1_all.mean(0, keepdims=True),
                w2=w2, b2=b2_all.mean(0, keepdims=True))


# ----------------------------------------------------------------------------
# Pure-JAX reference (mirrors the PyTorch forward) for a correctness check
# ----------------------------------------------------------------------------
def _reference_inception(x_nhwc, w_packed, b_mean, num_kernels):
    outs, off = [], 0
    for kk in range(num_kernels):
        ks = 2 * kk + 1
        w = w_packed[off:off + ks * ks].reshape(ks, ks, x_nhwc.shape[-1], -1)
        off += ks * ks
        outs.append(lax.conv_general_dilated(
            x_nhwc, w, window_strides=(1, 1), padding="SAME",
            dimension_numbers=("NHWC", "HWIO", "NHWC")))
    return jnp.mean(jnp.stack(outs, 0), 0) + b_mean[0]


def reference_forward(x, params, *, seq_len, pred_len, top_k, num_kernels):
    B, T, N = x.shape
    total = seq_len + pred_len
    periods, period_weight = fft_for_period(x, top_k)
    res = []
    for i in range(top_k):
        p = int(periods[i])
        if total % p != 0:
            length = (total // p + 1) * p
            out = jnp.concatenate(
                [x, jnp.zeros((B, length - total, N), x.dtype)], axis=1)
        else:
            length = total
            out = x
        out = out.reshape(B, length // p, p, N)
        h = _reference_inception(out, params["w1"], params["b1"], num_kernels)
        h = jax.nn.gelu(h, approximate=False)
        h = _reference_inception(h, params["w2"], params["b2"], num_kernels)
        res.append(h.reshape(B, length, N)[:, :total, :])
    res = jnp.stack(res, axis=-1)
    pw = jax.nn.softmax(period_weight, axis=1)[:, None, None, :]
    return jnp.sum(res * pw, -1) + x


# ----------------------------------------------------------------------------
if __name__ == "__main__":
    B, seq_len, d_model, d_ff, num_kernels, top_k = 2, 8, 8, 16, 2, 2
    T = seq_len + seq_len          # module sets pred_len = seq_len

    key = jax.random.PRNGKey(0)
    kx, kp = jax.random.split(key)
    x = jax.random.normal(kx, (B, T, d_model), jnp.float32)
    params = init_params(kp, d_model, d_ff, num_kernels)

    y = timesblock_forward(x, params, seq_len=seq_len, pred_len=seq_len,
                           top_k=top_k, num_kernels=num_kernels)
    y = jax.block_until_ready(y)
    assert y.shape == (B, T, d_model) and y.dtype == jnp.float32

    y_ref = jax.block_until_ready(
        reference_forward(x, params, seq_len=seq_len, pred_len=seq_len,
                          top_k=top_k, num_kernels=num_kernels))
    np.testing.assert_allclose(np.asarray(y), np.asarray(y_ref),
                               rtol=1e-3, atol=1e-3)

    print("KERNEL_OK")
</pallas_src>

<mosaic_0001>
module attributes {stable_mosaic.version = 11 : i64} {
  func.func @conv_stack_kernel(%arg0: i32, %arg1: memref<1x36x8xf32, #tpu.memory_space<vmem>>, %arg2: memref<10x8x16xf32, #tpu.memory_space<vmem>>, %arg3: memref<1x16xf32, #tpu.memory_space<vmem>>, %arg4: memref<10x16x8xf32, #tpu.memory_space<vmem>>, %arg5: memref<1x8xf32, #tpu.memory_space<vmem>>, %arg6: memref<1x22x8xf32, #tpu.memory_space<vmem>>, %arg7: memref<36x16xf32, #tpu.memory_space<vmem>>) attributes {dimension_semantics = [#tpu.dimension_semantics<parallel>], iteration_bounds = array<i64: 2>, scalar_prefetch = 0 : i64, scratch_operands = 1 : i64, tpu.core_type = #tpu.core_type<tc>, window_params = [{transform_indices = @transform_0, window_bounds = array<i64: 1, 36, 8>}, {pipeline_mode = #tpu.pipeline_mode<synchronous>, transform_indices = @transform_1, window_bounds = array<i64: 10, 8, 16>}, {pipeline_mode = #tpu.pipeline_mode<synchronous>, transform_indices = @transform_2, window_bounds = array<i64: 1, 16>}, {pipeline_mode = #tpu.pipeline_mode<synchronous>, transform_indices = @transform_3, window_bounds = array<i64: 10, 16, 8>}, {pipeline_mode = #tpu.pipeline_mode<synchronous>, transform_indices = @transform_4, window_bounds = array<i64: 1, 8>}, {transform_indices = @transform_5, window_bounds = array<i64: 1, 22, 8>}]} {
    %cst = arith.constant 0.000000e+00 : f32
    %0 = vector.broadcast %cst : f32 to vector<22x16xf32>
    %c0 = arith.constant 0 : index
    %c7 = arith.constant 7 : index
    %c0_0 = arith.constant 0 : index
    %1 = vector.load %arg1[%c0, %c7, %c0_0] : memref<1x36x8xf32, #tpu.memory_space<vmem>>, vector<1x22x8xf32>
    %2 = vector.shape_cast %1 : vector<1x22x8xf32> to vector<22x8xf32>
    %c0_1 = arith.constant 0 : index
    %c0_2 = arith.constant 0 : index
    %c0_3 = arith.constant 0 : index
    %3 = vector.load %arg2[%c0_1, %c0_2, %c0_3] : memref<10x8x16xf32, #tpu.memory_space<vmem>>, vector<1x8x16xf32>
    %4 = vector.shape_cast %3 : vector<1x8x16xf32> to vector<8x16xf32>
    %cst_4 = arith.constant dense<0.000000e+00> : vector<22x16xf32>
    %5 = tpu.matmul %2, %4, %cst_4 {dimension_numbers = #tpu.dot_dimension_numbers<[1], [0], [0], [1], [0, 0, 1, 1], [], []>} : vector<22x8xf32>, vector<8x16xf32>, vector<22x16xf32> -> vector<22x16xf32>
    %6 = arith.addf %0, %5 : vector<22x16xf32>
    %c0_5 = arith.constant 0 : index
    %c0_6 = arith.constant 0 : index
    %c0_7 = arith.constant 0 : index
    %7 = vector.load %arg1[%c0_5, %c0_6, %c0_7] : memref<1x36x8xf32, #tpu.memory_space<vmem>>, vector<1x22x8xf32>
    %8 = vector.shape_cast %7 : vector<1x22x8xf32> to vector<22x8xf32>
    %c1 = arith.constant 1 : index
    %c0_8 = arith.constant 0 : index
    %c0_9 = arith.constant 0 : index
    %9 = vector.load %arg2[%c1, %c0_8, %c0_9] : memref<10x8x16xf32, #tpu.memory_space<vmem>>, vector<1x8x16xf32>
    %10 = vector.shape_cast %9 : vector<1x8x16xf32> to vector<8x16xf32>
    %cst_10 = arith.constant dense<0.000000e+00> : vector<22x16xf32>
    %11 = tpu.matmul %8, %10, %cst_10 {dimension_numbers = #tpu.dot_dimension_numbers<[1], [0], [0], [1], [0, 0, 1, 1], [], []>} : vector<22x8xf32>, vector<8x16xf32>, vector<22x16xf32> -> vector<22x16xf32>
    %12 = arith.addf %6, %11 : vector<22x16xf32>
    %c0_11 = arith.constant 0 : index
    %c1_12 = arith.constant 1 : index
    %c0_13 = arith.constant 0 : index
    %13 = vector.load %arg1[%c0_11, %c1_12, %c0_13] : memref<1x36x8xf32, #tpu.memory_space<vmem>>, vector<1x22x8xf32>
    %14 = vector.shape_cast %13 : vector<1x22x8xf32> to vector<22x8xf32>
    %c2 = arith.constant 2 : index
    %c0_14 = arith.constant 0 : index
    %c0_15 = arith.constant 0 : index
    %15 = vector.load %arg2[%c2, %c0_14, %c0_15] : memref<10x8x16xf32, #tpu.memory_space<vmem>>, vector<1x8x16xf32>
    %16 = vector.shape_cast %15 : vector<1x8x16xf32> to vector<8x16xf32>
    %cst_16 = arith.constant dense<0.000000e+00> : vector<22x16xf32>
    %17 = tpu.matmul %14, %16, %cst_16 {dimension_numbers = #tpu.dot_dimension_numbers<[1], [0], [0], [1], [0, 0, 1, 1], [], []>} : vector<22x8xf32>, vector<8x16xf32>, vector<22x16xf32> -> vector<22x16xf32>
    %18 = arith.addf %12, %17 : vector<22x16xf32>
    %c0_17 = arith.constant 0 : index
    %c2_18 = arith.constant 2 : index
    %c0_19 = arith.constant 0 : index
    %19 = vector.load %arg1[%c0_17, %c2_18, %c0_19] : memref<1x36x8xf32, #tpu.memory_space<vmem>>, vector<1x22x8xf32>
    %20 = vector.shape_cast %19 : vector<1x22x8xf32> to vector<22x8xf32>
    %c3 = arith.constant 3 : index
    %c0_20 = arith.constant 0 : index
    %c0_21 = arith.constant 0 : index
    %21 = vector.load %arg2[%c3, %c0_20, %c0_21] : memref<10x8x16xf32, #tpu.memory_space<vmem>>, vector<1x8x16xf32>
    %22 = vector.shape_cast %21 : vector<1x8x16xf32> to vector<8x16xf32>
    %cst_22 = arith.constant dense<0.000000e+00> : vector<22x16xf32>
    %23 = tpu.matmul %20, %22, %cst_22 {dimension_numbers = #tpu.dot_dimension_numbers<[1], [0], [0], [1], [0, 0, 1, 1], [], []>} : vector<22x8xf32>, vector<8x16xf32>, vector<22x16xf32> -> vector<22x16xf32>
    %24 = arith.addf %18, %23 : vector<22x16xf32>
    %c0_23 = arith.constant 0 : index
    %c6 = arith.constant 6 : index
    %c0_24 = arith.constant 0 : index
    %25 = vector.load %arg1[%c0_23, %c6, %c0_24] : memref<1x36x8xf32, #tpu.memory_space<vmem>>, vector<1x22x8xf32>
    %26 = vector.shape_cast %25 : vector<1x22x8xf32> to vector<22x8xf32>
    %c4 = arith.constant 4 : index
    %c0_25 = arith.constant 0 : index
    %c0_26 = arith.constant 0 : index
    %27 = vector.load %arg2[%c4, %c0_25, %c0_26] : memref<10x8x16xf32, #tpu.memory_space<vmem>>, vector<1x8x16xf32>
    %28 = vector.shape_cast %27 : vector<1x8x16xf32> to vector<8x16xf32>
    %cst_27 = arith.constant dense<0.000000e+00> : vector<22x16xf32>
    %29 = tpu.matmul %26, %28, %cst_27 {dimension_numbers = #tpu.dot_dimension_numbers<[1], [0], [0], [1], [0, 0, 1, 1], [], []>} : vector<22x8xf32>, vector<8x16xf32>, vector<22x16xf32> -> vector<22x16xf32>
    %30 = arith.addf %24, %29 : vector<22x16xf32>
    %c0_28 = arith.constant 0 : index
    %c7_29 = arith.constant 7 : index
    %c0_30 = arith.constant 0 : index
    %31 = vector.load %arg1[%c0_28, %c7_29, %c0_30] : memref<1x36x8xf32, #tpu.memory_space<vmem>>, vector<1x22x8xf32>
    %32 = vector.shape_cast %31 : vector<1x22x8xf32> to vector<22x8xf32>
    %c5 = arith.constant 5 : index
    %c0_31 = arith.constant 0 : index
    %c0_32 = arith.constant 0 : index
    %33 = vector.load %arg2[%c5, %c0_31, %c0_32] : memref<10x8x16xf32, #tpu.memory_space<vmem>>, vector<1x8x16xf32>
    %34 = vector.shape_cast %33 : vector<1x8x16xf32> to vector<8x16xf32>
    %cst_33 = arith.constant dense<0.000000e+00> : vector<22x16xf32>
    %35 = tpu.matmul %32, %34, %cst_33 {dimension_numbers = #tpu.dot_dimension_numbers<[1], [0], [0], [1], [0, 0, 1, 1], [], []>} : vector<22x8xf32>, vector<8x16xf32>, vector<22x16xf32> -> vector<22x16xf32>
    %36 = arith.addf %30, %35 : vector<22x16xf32>
    %c0_34 = arith.constant 0 : index
    %c8 = arith.constant 8 : index
    %c0_35 = arith.constant 0 : index
    %37 = vector.load %arg1[%c0_34, %c8, %c0_35] : memref<1x36x8xf32, #tpu.memory_space<vmem>>, vector<1x22x8xf32>
    %38 = vector.shape_cast %37 : vector<1x22x8xf32> to vector<22x8xf32>
    %c6_36 = arith.constant 6 : index
    %c0_37 = arith.constant 0 : index
    %c0_38 = arith.constant 0 : index
    %39 = vector.load %arg2[%c6_36, %c0_37, %c0_38] : memref<10x8x16xf32, #tpu.memory_space<vmem>>, vector<1x8x16xf32>
    %40 = vector.shape_cast %39 : vector<1x8x16xf32> to vector<8x16xf32>
    %cst_39 = arith.constant dense<0.000000e+00> : vector<22x16xf32>
    %41 = tpu.matmul %38, %40, %cst_39 {dimension_numbers = #tpu.dot_dimension_numbers<[1], [0], [0], [1], [0, 0, 1, 1], [], []>} : vector<22x8xf32>, vector<8x16xf32>, vector<22x16xf32> -> vector<22x16xf32>
    %42 = arith.addf %36, %41 : vector<22x16xf32>
    %c0_40 = arith.constant 0 : index
    %c12 = arith.constant 12 : index
    %c0_41 = arith.constant 0 : index
    %43 = vector.load %arg1[%c0_40, %c12, %c0_41] : memref<1x36x8xf32, #tpu.memory_space<vmem>>, vector<1x22x8xf32>
    %44 = vector.shape_cast %43 : vector<1x22x8xf32> to vector<22x8xf32>
    %c7_42 = arith.constant 7 : index
    %c0_43 = arith.constant 0 : index
    %c0_44 = arith.constant 0 : index
    %45 = vector.load %arg2[%c7_42, %c0_43, %c0_44] : memref<10x8x16xf32, #tpu.memory_space<vmem>>, vector<1x8x16xf32>
    %46 = vector.shape_cast %45 : vector<1x8x16xf32> to vector<8x16xf32>
    %cst_45 = arith.constant dense<0.000000e+00> : vector<22x16xf32>
    %47 = tpu.matmul %44, %46, %cst_45 {dimension_numbers = #tpu.dot_dimension_numbers<[1], [0], [0], [1], [0, 0, 1, 1], [], []>} : vector<22x8xf32>, vector<8x16xf32>, vector<22x16xf32> -> vector<22x16xf32>
    %48 = arith.addf %42, %47 : vector<22x16xf32>
    %c0_46 = arith.constant 0 : index
    %c13 = arith.constant 13 : index
    %c0_47 = arith.constant 0 : index
    %49 = vector.load %arg1[%c0_46, %c13, %c0_47] : memref<1x36x8xf32, #tpu.memory_space<vmem>>, vector<1x22x8xf32>
    %50 = vector.shape_cast %49 : vector<1x22x8xf32> to vector<22x8xf32>
    %c8_48 = arith.constant 8 : index
    %c0_49 = arith.constant 0 : index
    %c0_50 = arith.constant 0 : index
    %51 = vector.load %arg2[%c8_48, %c0_49, %c0_50] : memref<10x8x16xf32, #tpu.memory_space<vmem>>, vector<1x8x16xf32>
    %52 = vector.shape_cast %51 : vector<1x8x16xf32> to vector<8x16xf32>
    %cst_51 = arith.constant dense<0.000000e+00> : vector<22x16xf32>
    %53 = tpu.matmul %50, %52, %cst_51 {dimension_numbers = #tpu.dot_dimension_numbers<[1], [0], [0], [1], [0, 0, 1, 1], [], []>} : vector<22x8xf32>, vector<8x16xf32>, vector<22x16xf32> -> vector<22x16xf32>
    %54 = arith.addf %48, %53 : vector<22x16xf32>
    %c0_52 = arith.constant 0 : index
    %c14 = arith.constant 14 : index
    %c0_53 = arith.constant 0 : index
    %55 = vector.load %arg1[%c0_52, %c14, %c0_53] : memref<1x36x8xf32, #tpu.memory_space<vmem>>, vector<1x22x8xf32>
    %56 = vector.shape_cast %55 : vector<1x22x8xf32> to vector<22x8xf32>
    %c9 = arith.constant 9 : index
    %c0_54 = arith.constant 0 : index
    %c0_55 = arith.constant 0 : index
    %57 = vector.load %arg2[%c9, %c0_54, %c0_55] : memref<10x8x16xf32, #tpu.memory_space<vmem>>, vector<1x8x16xf32>
    %58 = vector.shape_cast %57 : vector<1x8x16xf32> to vector<8x16xf32>
    %cst_56 = arith.constant dense<0.000000e+00> : vector<22x16xf32>
    %59 = tpu.matmul %56, %58, %cst_56 {dimension_numbers = #tpu.dot_dimension_numbers<[1], [0], [0], [1], [0, 0, 1, 1], [], []>} : vector<22x8xf32>, vector<8x16xf32>, vector<22x16xf32> -> vector<22x16xf32>
    %60 = arith.addf %54, %59 : vector<22x16xf32>
    %c0_57 = arith.constant 0 : index
    %c0_58 = arith.constant 0 : index
    %61 = vector.load %arg3[%c0_57, %c0_58] : memref<1x16xf32, #tpu.memory_space<vmem>>, vector<1x16xf32>
    %62 = vector.broadcast %61 : vector<1x16xf32> to vector<22x16xf32>
    %63 = arith.addf %60, %62 : vector<22x16xf32>
    %cst_59 = arith.constant 5.000000e-01 : f32
    %64 = vector.broadcast %cst_59 : f32 to vector<22x16xf32>
    %65 = arith.mulf %64, %63 : vector<22x16xf32>
    %cst_60 = arith.constant 0.707106769 : f32
    %66 = vector.broadcast %cst_60 : f32 to vector<22x16xf32>
    %67 = arith.mulf %63, %66 : vector<22x16xf32>
    %68 = math.absf %67 : vector<22x16xf32>
    %cst_61 = arith.constant 0.327591091 : f32
    %69 = vector.broadcast %cst_61 : f32 to vector<22x16xf32>
    %70 = arith.mulf %69, %68 : vector<22x16xf32>
    %cst_62 = arith.constant 1.000000e+00 : f32
    %71 = vector.broadcast %cst_62 : f32 to vector<22x16xf32>
    %72 = arith.addf %71, %70 : vector<22x16xf32>
    %cst_63 = arith.constant 1.000000e+00 : f32
    %73 = vector.broadcast %cst_63 : f32 to vector<22x16xf32>
    %74 = arith.divf %73, %72 : vector<22x16xf32>
    %cst_64 = arith.constant 1.06140542 : f32
    %75 = vector.broadcast %cst_64 : f32 to vector<22x16xf32>
    %76 = arith.mulf %75, %74 : vector<22x16xf32>
    %cst_65 = arith.constant -1.45315206 : f32
    %77 = vector.broadcast %cst_65 : f32 to vector<22x16xf32>
    %78 = arith.addf %76, %77 : vector<22x16xf32>
    %79 = arith.mulf %78, %74 : vector<22x16xf32>
    %cst_66 = arith.constant 1.42141378 : f32
    %80 = vector.broadcast %cst_66 : f32 to vector<22x16xf32>
    %81 = arith.addf %79, %80 : vector<22x16xf32>
    %82 = arith.mulf %81, %74 : vector<22x16xf32>
    %cst_67 = arith.constant -0.284496725 : f32
    %83 = vector.broadcast %cst_67 : f32 to vector<22x16xf32>
    %84 = arith.addf %82, %83 : vector<22x16xf32>
    %85 = arith.mulf %84, %74 : vector<22x16xf32>
    %cst_68 = arith.constant 0.254829586 : f32
    %86 = vector.broadcast %cst_68 : f32 to vector<22x16xf32>
    %87 = arith.addf %85, %86 : vector<22x16xf32>
    %88 = arith.mulf %87, %74 : vector<22x16xf32>
    %89 = arith.mulf %68, %68 : vector<22x16xf32>
    %cst_69 = arith.constant 0.000000e+00 : f32
    %90 = vector.broadcast %cst_69 : f32 to vector<22x16xf32>
    %91 = arith.subf %90, %89 : vector<22x16xf32>
    %92 = math.exp %91 : vector<22x16xf32>
    %93 = arith.mulf %88, %92 : vector<22x16xf32>
    %cst_70 = arith.constant 1.000000e+00 : f32
    %94 = vector.broadcast %cst_70 : f32 to vector<22x16xf32>
    %95 = arith.subf %94, %93 : vector<22x16xf32>
    %cst_71 = arith.constant 0.000000e+00 : f32
    %96 = vector.broadcast %cst_71 : f32 to vector<22x16xf32>
    %97 = arith.cmpf olt, %67, %96 : vector<22x16xf32>
    %cst_72 = arith.constant 0.000000e+00 : f32
    %98 = vector.broadcast %cst_72 : f32 to vector<22x16xf32>
    %99 = arith.subf %98, %95 : vector<22x16xf32>
    %100 = arith.select %97, %99, %95 : vector<22x16xi1>, vector<22x16xf32>
    %cst_73 = arith.constant 1.000000e+00 : f32
    %101 = vector.broadcast %cst_73 : f32 to vector<22x16xf32>
    %102 = arith.addf %101, %100 : vector<22x16xf32>
    %103 = arith.mulf %65, %102 : vector<22x16xf32>
    %104 = tpu.iota {dimensions = array<i32: 0>} : vector<22x1xi32>
    %c7_i32 = arith.constant 7 : i32
    %105 = vector.broadcast %c7_i32 : i32 to vector<22x1xi32>
    %106 = arith.addi %104, %105 : vector<22x1xi32>
    %c6_i32 = arith.constant 6 : i32
    %c0_i32 = arith.constant 0 : i32
    %107 = arith.cmpi eq, %c6_i32, %c0_i32 : i32
    %c1_i32 = arith.constant 1 : i32
    %108 = arith.select %107, %c1_i32, %c6_i32 : i32
    %109 = vector.broadcast %108 : i32 to vector<22x1xi32>
    %110 = arith.remsi %106, %109 : vector<22x1xi32>
    %c0_i32_74 = arith.constant 0 : i32
    %111 = vector.broadcast %c0_i32_74 : i32 to vector<22x1xi32>
    %112 = arith.cmpi ne, %110, %111 : vector<22x1xi32>
    %c0_i32_75 = arith.constant 0 : i32
    %113 = vector.broadcast %c0_i32_75 : i32 to vector<22x1xi32>
    %114 = arith.cmpi slt, %110, %113 : vector<22x1xi32>
    %c0_i32_76 = arith.constant 0 : i32
    %115 = arith.cmpi slt, %108, %c0_i32_76 : i32
    %116 = vector.broadcast %115 : i1 to vector<22x1xi1>
    %117 = vector.broadcast %116 : vector<22x1xi1> to vector<22x1xi1>
    %118 = arith.xori %114, %117 : vector<22x1xi1>
    %119 = arith.andi %118, %112 : vector<22x1xi1>
    %120 = vector.broadcast %108 : i32 to vector<22x1xi32>
    %121 = arith.addi %110, %120 : vector<22x1xi32>
    %122 = arith.select %119, %121, %110 : vector<22x1xi1>, vector<22x1xi32>
    %c1_i32_77 = arith.constant 1 : i32
    %123 = vector.broadcast %c1_i32_77 : i32 to vector<22x1xi32>
    %124 = arith.cmpi sge, %122, %123 : vector<22x1xi32>
    %c5_i32 = arith.constant 5 : i32
    %125 = vector.broadcast %c5_i32 : i32 to vector<22x1xi32>
    %126 = arith.cmpi slt, %122, %125 : vector<22x1xi32>
    %127 = arith.andi %124, %126 : vector<22x1xi1>
    %cst_78 = arith.constant 0.000000e+00 : f32
    %128 = vector.shape_cast %127 : vector<22x1xi1> to vector<22x1xi1>
    %129 = vector.broadcast %128 : vector<22x1xi1> to vector<22x16xi1>
    %130 = vector.broadcast %cst_78 : f32 to vector<22x16xf32>
    %131 = arith.select %129, %103, %130 : vector<22x16xi1>, vector<22x16xf32>
    %cst_79 = arith.constant 0.000000e+00 : f32
    %132 = vector.broadcast %cst_79 : f32 to vector<7x16xf32>
    %c0_80 = arith.constant 0 : index
    %c0_81 = arith.constant 0 : index
    %133 = vector.load %arg7[%c0_80, %c0_81] : memref<36x16xf32, #tpu.memory_space<vmem>>, vector<7x16xf32>
    tpu.vector_store %arg7[%c0_80, %c0_81], %132 {strides = array<i32>} : memref<36x16xf32, #tpu.memory_space<vmem>>, vector<7x16xf32>,
    %cst_82 = arith.constant 0.000000e+00 : f32
    %134 = vector.broadcast %cst_82 : f32 to vector<7x16xf32>
    %c29 = arith.constant 29 : index
    %c0_83 = arith.constant 0 : index
    %135 = vector.load %arg7[%c29, %c0_83] : memref<36x16xf32, #tpu.memory_space<vmem>>, vector<7x16xf32>
    tpu.vector_store %arg7[%c29, %c0_83], %134 {strides = array<i32>} : memref<36x16xf32, #tpu.memory_space<vmem>>, vector<7x16xf32>,
    %c7_84 = arith.constant 7 : index
    %c0_85 = arith.constant 0 : index
    %136 = vector.load %arg7[%c7_84, %c0_85] : memref<36x16xf32, #tpu.memory_space<vmem>>, vector<22x16xf32>
    tpu.vector_store %arg7[%c7_84, %c0_85], %131 {strides = array<i32>} : memref<36x16xf32, #tpu.memory_space<vmem>>, vector<22x16xf32>,
    %cst_86 = arith.constant 0.000000e+00 : f32
    %137 = vector.broadcast %cst_86 : f32 to vector<22x8xf32>
    %c7_87 = arith.constant 7 : index
    %c0_88 = arith.constant 0 : index
    %138 = vector.load %arg7[%c7_87, %c0_88] : memref<36x16xf32, #tpu.memory_space<vmem>>, vector<22x16xf32>
    %c0_89 = arith.constant 0 : index
    %c0_90 = arith.constant 0 : index
    %c0_91 = arith.constant 0 : index
    %139 = vector.load %arg4[%c0_89, %c0_90, %c0_91] : memref<10x16x8xf32, #tpu.memory_space<vmem>>, vector<1x16x8xf32>
    %140 = vector.shape_cast %139 : vector<1x16x8xf32> to vector<16x8xf32>
    %cst_92 = arith.constant dense<0.000000e+00> : vector<22x8xf32>
    %141 = tpu.matmul %138, %140, %cst_92 {dimension_numbers = #tpu.dot_dimension_numbers<[1], [0], [0], [1], [0, 0, 1, 1], [], []>} : vector<22x16xf32>, vector<16x8xf32>, vector<22x8xf32> -> vector<22x8xf32>
    %142 = arith.addf %137, %141 : vector<22x8xf32>
    %c0_93 = arith.constant 0 : index
    %c0_94 = arith.constant 0 : index
    %143 = vector.load %arg7[%c0_93, %c0_94] : memref<36x16xf32, #tpu.memory_space<vmem>>, vector<22x16xf32>
    %c1_95 = arith.constant 1 : index
    %c0_96 = arith.constant 0 : index
    %c0_97 = arith.constant 0 : index
    %144 = vector.load %arg4[%c1_95, %c0_96, %c0_97] : memref<10x16x8xf32, #tpu.memory_space<vmem>>, vector<1x16x8xf32>
    %145 = vector.shape_cast %144 : vector<1x16x8xf32> to vector<16x8xf32>
    %cst_98 = arith.constant dense<0.000000e+00> : vector<22x8xf32>
    %146 = tpu.matmul %143, %145, %cst_98 {dimension_numbers = #tpu.dot_dimension_numbers<[1], [0], [0], [1], [0, 0, 1, 1], [], []>} : vector<22x16xf32>, vector<16x8xf32>, vector<22x8xf32> -> vector<22x8xf32>
    %147 = arith.addf %142, %146 : vector<22x8xf32>
    %c1_99 = arith.constant 1 : index
    %c0_100 = arith.constant 0 : index
    %148 = vector.load %arg7[%c1_99, %c0_100] : memref<36x16xf32, #tpu.memory_space<vmem>>, vector<22x16xf32>
    %c2_101 = arith.constant 2 : index
    %c0_102 = arith.constant 0 : index
    %c0_103 = arith.constant 0 : index
    %149 = vector.load %arg4[%c2_101, %c0_102, %c0_103] : memref<10x16x8xf32, #tpu.memory_space<vmem>>, vector<1x16x8xf32>
    %150 = vector.shape_cast %149 : vector<1x16x8xf32> to vector<16x8xf32>
    %cst_104 = arith.constant dense<0.000000e+00> : vector<22x8xf32>
    %151 = tpu.matmul %148, %150, %cst_104 {dimension_numbers = #tpu.dot_dimension_numbers<[1], [0], [0], [1], [0, 0, 1, 1], [], []>} : vector<22x16xf32>, vector<16x8xf32>, vector<22x8xf32> -> vector<22x8xf32>
    %152 = arith.addf %147, %151 : vector<22x8xf32>
    %c2_105 = arith.constant 2 : index
    %c0_106 = arith.constant 0 : index
    %153 = vector.load %arg7[%c2_105, %c0_106] : memref<36x16xf32, #tpu.memory_space<vmem>>, vector<22x16xf32>
    %c3_107 = arith.constant 3 : index
    %c0_108 = arith.constant 0 : index
    %c0_109 = arith.constant 0 : index
    %154 = vector.load %arg4[%c3_107, %c0_108, %c0_109] : memref<10x16x8xf32, #tpu.memory_space<vmem>>, vector<1x16x8xf32>
    %155 = vector.shape_cast %154 : vector<1x16x8xf32> to vector<16x8xf32>
    %cst_110 = arith.constant dense<0.000000e+00> : vector<22x8xf32>
    %156 = tpu.matmul %153, %155, %cst_110 {dimension_numbers = #tpu.dot_dimension_numbers<[1], [0], [0], [1], [0, 0, 1, 1], [], []>} : vector<22x16xf32>, vector<16x8xf32>, vector<22x8xf32> -> vector<22x8xf32>
    %157 = arith.addf %152, %156 : vector<22x8xf32>
    %c6_111 = arith.constant 6 : index
    %c0_112 = arith.constant 0 : index
    %158 = vector.load %arg7[%c6_111, %c0_112] : memref<36x16xf32, #tpu.memory_space<vmem>>, vector<22x16xf32>
    %c4_113 = arith.constant 4 : index
    %c0_114 = arith.constant 0 : index
    %c0_115 = arith.constant 0 : index
    %159 = vector.load %arg4[%c4_113, %c0_114, %c0_115] : memref<10x16x8xf32, #tpu.memory_space<vmem>>, vector<1x16x8xf32>
    %160 = vector.shape_cast %159 : vector<1x16x8xf32> to vector<16x8xf32>
    %cst_116 = arith.constant dense<0.000000e+00> : vector<22x8xf32>
    %161 = tpu.matmul %158, %160, %cst_116 {dimension_numbers = #tpu.dot_dimension_numbers<[1], [0], [0], [1], [0, 0, 1, 1], [], []>} : vector<22x16xf32>, vector<16x8xf32>, vector<22x8xf32> -> vector<22x8xf32>
    %162 = arith.addf %157, %161 : vector<22x8xf32>
    %c7_117 = arith.constant 7 : index
    %c0_118 = arith.constant 0 : index
    %163 = vector.load %arg7[%c7_117, %c0_118] : memref<36x16xf32, #tpu.memory_space<vmem>>, vector<22x16xf32>
    %c5_119 = arith.constant 5 : index
    %c0_120 = arith.constant 0 : index
    %c0_121 = arith.constant 0 : index
    %164 = vector.load %arg4[%c5_119, %c0_120, %c0_121] : memref<10x16x8xf32, #tpu.memory_space<vmem>>, vector<1x16x8xf32>
    %165 = vector.shape_cast %164 : vector<1x16x8xf32> to vector<16x8xf32>
    %cst_122 = arith.constant dense<0.000000e+00> : vector<22x8xf32>
    %166 = tpu.matmul %163, %165, %cst_122 {dimension_numbers = #tpu.dot_dimension_numbers<[1], [0], [0], [1], [0, 0, 1, 1], [], []>} : vector<22x16xf32>, vector<16x8xf32>, vector<22x8xf32> -> vector<22x8xf32>
    %167 = arith.addf %162, %166 : vector<22x8xf32>
    %c8_123 = arith.constant 8 : index
    %c0_124 = arith.constant 0 : index
    %168 = vector.load %arg7[%c8_123, %c0_124] : memref<36x16xf32, #tpu.memory_space<vmem>>, vector<22x16xf32>
    %c6_125 = arith.constant 6 : index
    %c0_126 = arith.constant 0 : index
    %c0_127 = arith.constant 0 : index
    %169 = vector.load %arg4[%c6_125, %c0_126, %c0_127] : memref<10x16x8xf32, #tpu.memory_space<vmem>>, vector<1x16x8xf32>
    %170 = vector.shape_cast %169 : vector<1x16x8xf32> to vector<16x8xf32>
    %cst_128 = arith.constant dense<0.000000e+00> : vector<22x8xf32>
    %171 = tpu.matmul %168, %170, %cst_128 {dimension_numbers = #tpu.dot_dimension_numbers<[1], [0], [0], [1], [0, 0, 1, 1], [], []>} : vector<22x16xf32>, vector<16x8xf32>, vector<22x8xf32> -> vector<22x8xf32>
    %172 = arith.addf %167, %171 : vector<22x8xf32>
    %c12_129 = arith.constant 12 : index
    %c0_130 = arith.constant 0 : index
    %173 = vector.load %arg7[%c12_129, %c0_130] : memref<36x16xf32, #tpu.memory_space<vmem>>, vector<22x16xf32>
    %c7_131 = arith.constant 7 : index
    %c0_132 = arith.constant 0 : index
    %c0_133 = arith.constant 0 : index
    %174 = vector.load %arg4[%c7_131, %c0_132, %c0_133] : memref<10x16x8xf32, #tpu.memory_space<vmem>>, vector<1x16x8xf32>
    %175 = vector.shape_cast %174 : vector<1x16x8xf32> to vector<16x8xf32>
    %cst_134 = arith.constant dense<0.000000e+00> : vector<22x8xf32>
    %176 = tpu.matmul %173, %175, %cst_134 {dimension_numbers = #tpu.dot_dimension_numbers<[1], [0], [0], [1], [0, 0, 1, 1], [], []>} : vector<22x16xf32>, vector<16x8xf32>, vector<22x8xf32> -> vector<22x8xf32>
    %177 = arith.addf %172, %176 : vector<22x8xf32>
    %c13_135 = arith.constant 13 : index
    %c0_136 = arith.constant 0 : index
    %178 = vector.load %arg7[%c13_135, %c0_136] : memref<36x16xf32, #tpu.memory_space<vmem>>, vector<22x16xf32>
    %c8_137 = arith.constant 8 : index
    %c0_138 = arith.constant 0 : index
    %c0_139 = arith.constant 0 : index
    %179 = vector.load %arg4[%c8_137, %c0_138, %c0_139] : memref<10x16x8xf32, #tpu.memory_space<vmem>>, vector<1x16x8xf32>
    %180 = vector.shape_cast %179 : vector<1x16x8xf32> to vector<16x8xf32>
    %cst_140 = arith.constant dense<0.000000e+00> : vector<22x8xf32>
    %181 = tpu.matmul %178, %180, %cst_140 {dimension_numbers = #tpu.dot_dimension_numbers<[1], [0], [0], [1], [0, 0, 1, 1], [], []>} : vector<22x16xf32>, vector<16x8xf32>, vector<22x8xf32> -> vector<22x8xf32>
    %182 = arith.addf %177, %181 : vector<22x8xf32>
    %c14_141 = arith.constant 14 : index
    %c0_142 = arith.constant 0 : index
    %183 = vector.load %arg7[%c14_141, %c0_142] : memref<36x16xf32, #tpu.memory_space<vmem>>, vector<22x16xf32>
    %c9_143 = arith.constant 9 : index
    %c0_144 = arith.constant 0 : index
    %c0_145 = arith.constant 0 : index
    %184 = vector.load %arg4[%c9_143, %c0_144, %c0_145] : memref<10x16x8xf32, #tpu.memory_space<vmem>>, vector<1x16x8xf32>
    %185 = vector.shape_cast %184 : vector<1x16x8xf32> to vector<16x8xf32>
    %cst_146 = arith.constant dense<0.000000e+00> : vector<22x8xf32>
    %186 = tpu.matmul %183, %185, %cst_146 {dimension_numbers = #tpu.dot_dimension_numbers<[1], [0], [0], [1], [0, 0, 1, 1], [], []>} : vector<22x16xf32>, vector<16x8xf32>, vector<22x8xf32> -> vector<22x8xf32>
    %187 = arith.addf %182, %186 : vector<22x8xf32>
    %c0_147 = arith.constant 0 : index
    %c0_148 = arith.constant 0 : index
    %188 = vector.load %arg5[%c0_147, %c0_148] : memref<1x8xf32, #tpu.memory_space<vmem>>, vector<1x8xf32>
    %189 = vector.broadcast %188 : vector<1x8xf32> to vector<22x8xf32>
    %190 = arith.addf %187, %189 : vector<22x8xf32>
    %c0_149 = arith.constant 0 : index
    %c0_150 = arith.constant 0 : index
    %c0_151 = arith.constant 0 : index
    %191 = vector.load %arg6[%c0_149, %c0_150, %c0_151] : memref<1x22x8xf32, #tpu.memory_space<vmem>>, vector<1x22x8xf32>
    %192 = vector.shape_cast %191 : vector<1x22x8xf32> to vector<22x8xf32>
    %193 = vector.shape_cast %190 : vector<22x8xf32> to vector<1x22x8xf32>
    tpu.vector_store %arg6[%c0_149, %c0_150, %c0_151], %193 {strides = array<i32>} : memref<1x22x8xf32, #tpu.memory_space<vmem>>, vector<1x22x8xf32>,
    return
  }
  func.func @transform_0(%arg0: i32) -> (i32, i32, i32) {
    %c0_i32 = arith.constant 0 : i32
    %c0_i32_0 = arith.constant 0 : i32
    %c0_i32_1 = arith.constant 0 : i32
    return %arg0, %c0_i32, %c0_i32_0 : i32, i32, i32
  }
  func.func @transform_1(%arg0: i32) -> (i32, i32, i32) {
    %c0_i32 = arith.constant 0 : i32
    %c0_i32_0 = arith.constant 0 : i32
    %c0_i32_1 = arith.constant 0 : i32
    %c0_i32_2 = arith.constant 0 : i32
    return %c0_i32, %c0_i32_0, %c0_i32_1 : i32, i32, i32
  }
  func.func @transform_2(%arg0: i32) -> (i32, i32) {
    %c0_i32 = arith.constant 0 : i32
    %c0_i32_0 = arith.constant 0 : i32
    %c0_i32_1 = arith.constant 0 : i32
    return %c0_i32, %c0_i32_0 : i32, i32
  }
  func.func @transform_3(%arg0: i32) -> (i32, i32, i32) {
    %c0_i32 = arith.constant 0 : i32
    %c0_i32_0 = arith.constant 0 : i32
    %c0_i32_1 = arith.constant 0 : i32
    %c0_i32_2 = arith.constant 0 : i32
    return %c0_i32, %c0_i32_0, %c0_i32_1 : i32, i32, i32
  }
  func.func @transform_4(%arg0: i32) -> (i32, i32) {
    %c0_i32 = arith.constant 0 : i32
    %c0_i32_0 = arith.constant 0 : i32
    %c0_i32_1 = arith.constant 0 : i32
    return %c0_i32, %c0_i32_0 : i32, i32
  }
  func.func @transform_5(%arg0: i32) -> (i32, i32, i32) {
    %c0_i32 = arith.constant 0 : i32
    %c0_i32_0 = arith.constant 0 : i32
    %c0_i32_1 = arith.constant 0 : i32
    return %arg0, %c0_i32, %c0_i32_0 : i32, i32, i32
  }
}

</mosaic_0001>

<bundles_post_ra>
// kernel: tpu_custom_call.1
= control target key start
LH: loop header
LB: loop body
LE: loop exit
PB: predicated region body
PF: predicated region fallthrough
CT: control target
= control target key end

     0   :  { %s2877_s18 = smov 0   ;;  %s3290_s0 = inlined_call_operand.vmem [shape: f32[2,36,8], index: 0, kind: input, shape index: {}]   ;;  %s3291_s1 = inlined_call_operand.vmem [shape: f32[10,8,16], index: 1, kind: input, shape index: {}]   ;;  %s3292_s2 = inlined_call_operand.vmem [shape: f32[1,16], index: 2, kind: input, shape index: {}]   ;;  %s3293_s3 = inlined_call_operand.vmem [shape: f32[10,16,8], index: 3, kind: input, shape index: {}]   ;;  %s3294_s4 = inlined_call_operand.vmem [shape: f32[1,8], index: 4, kind: input, shape index: {}]   ;;  %s3295_s5 = inlined_call_operand.vmem [shape: f32[2,22,8], index: 5, kind: output, shape index: {}]  }
   0x1 LB: > { %s2379_s19 = sadd.s32 4294967295, %s2843_s18   ;;  %p2383_p0 = scmp.ge.s32.totalorder %s2843_s18, 1  ;;  %s2843_s18 = sphi %s2877_s18, %s15_s18  }
   0x2   : > { %p187_p1 = scmp.lt.s32.totalorder %s2843_s18, 3 }
   0x4   : > { %p188_p2 = pnand %p2383_p0, %p187_p1 }
   0x5   : > { %p215_p3 = scmp.lt.s32.totalorder (!%p188_p2), %s2379_s19, 1 }
   0x6   : > { %191 = sbr.rel (%p188_p2) target bundleno = 579 (0x243), region = 40 }
   0xb   : > { %v2386_v0 = vld [vmem:[%s3291_s1 + $0x8] sm:$0xff]  ;;  %v228_v1 = vld [vmem:[%s3291_s1] sm:$0xff]  ;;  %v2845_v2 = vmov 0.0   ;;  %vm2846_vm0 = vmmov 0   ;;  %s3297_s19 = smov (!%p215_p3, %s2379_s19), 1  ;;  %vm234_vm1 = vcmask 64512  }
   0xc   : > { %2567 = vmatprep.subr.mxu0 %v2845_v2  ;;  %2578 = vmatprep.subr.mxu1 %v2845_v2  ;;  %s2807_s24 = smul.u32 40, %s3297_s19  ;;  %v2393_v3 = vld [vmem:[%s3291_s1 + $0x10] sm:$0xff]  ;;  %v2397_v4 = vld [vmem:[%s3291_s1 + $0x18] sm:$0xff]  ;;  %v2401_v13 = vld [vmem:[%s3291_s1 + $0x20] sm:$0xff]  ;;  %vm1341_vm2 = vcmask 129024  }
   0xd   : > { %2568 = vmatpush3.msra.mxu0 %v2386_v0  ;;  %2569 = vmatprep.mubr.msk.f32.mxu0 %vm2846_vm0, %v2845_v2  ;;  %v2405_v14 = vld [vmem:[%s3291_s1 + $0x28] sm:$0xff]  ;;  %v2409_v20 = vld [vmem:[%s3291_s1 + $0x30] sm:$0xff]  ;;  %v2413_v21 = vld [vmem:[%s3291_s1 + $0x38] sm:$0xff]  ;;  %1342 = vst.msk [vmem:[#allocation2] sm:$0x7f] %vm1341_vm2, %v2845_v2  ;;  %s2808_s15 = smul.u32 24, %s3297_s19 }
   0xe   : > { %2579 = vmatpush3.msra.mxu1 %v228_v1  ;;  %2580 = vmatprep.mubr.msk.f32.mxu1 %vm2846_vm0, %v2845_v2  ;;  %s2905_s27 = scalar_lea.vmem %s3290_s0, %s2807_s24  ;;  %v2417_v25 = vld [vmem:[%s3291_s1 + $0x40] sm:$0xff]  ;;  %v2421_v26 = vld [vmem:[%s3291_s1 + $0x48] sm:$0xff]  ;;  %1343 = vst.msk [vmem:[#allocation2 + $0x1d] sm:$0x7f] %vm1341_vm2, %v2845_v2  ;;  %v2427_v36 = vld [vmem:[%s3293_s3 + $0x18] sm:$0xff]  ;;  %vm1344_vm2 = vcmask 130048  }
   0xf   : > { %2589 = vmatprep.subr.mxu0 %v2845_v2  ;;  %2600 = vmatprep.subr.mxu1 %v2845_v2  ;;  %v229_v5 = vld [vmem:[%s2905_s27] sm:$0xff]  ;;  %v2918_v7 = vld [vmem:[%s2905_s27 + $0x8] sm:$0xff]  ;;  %v231_v9 = vld [vmem:[%s2905_s27 + $0x10] sm:$0x3f]  ;;  %s224_s22 = scalar_lea.vmem %s3295_s5, %s2808_s15 }
  0x10   : > { %v225_v6 = vld [vmem:[%s2905_s27 + $0x7] sm:$0xff]  ;;  %2570 = vmatmul.mubr.msk.f32.vlgmr.msra.gmra.mxu0 %vm234_vm1, %v229_v5  ;;  %v226_v8 = vld [vmem:[%s2905_s27 + $0xf] sm:$0xff]  ;;  %v227_v10 = vld [vmem:[%s2905_s27 + $0x17] sm:$0x3f] }
  0x11   : > { %2581 = vmatmul.mubr.msk.f32.vlgmr.msra.gmra.mxu1 %vm234_vm1, %v225_v6  ;;  %2590 = vmatpush3.msra.mxu0 %v2393_v3  ;;  %v413_v11 = vld [vmem:[%s2905_s27 + $0x1] sm:$0xff]  ;;  %v414_v15 = vld [vmem:[%s2905_s27 + $0x9] sm:$0xff]  ;;  %v415_v17 = vld [vmem:[%s2905_s27 + $0x11] sm:$0x3f] }
  0x12   : > { %2601 = vmatpush3.msra.mxu1 %v2397_v4  ;;  %2572 = vmatprep.mubr.msk.f32.mxu0 %vm2846_vm0, %v2845_v2  ;;  %v510_v12 = vld [vmem:[%s2905_s27 + $0x2] sm:$0xff]  ;;  %v511_v16 = vld [vmem:[%s2905_s27 + $0xa] sm:$0xff]  ;;  %v512_v18 = vld [vmem:[%s2905_s27 + $0x12] sm:$0x3f] }
  0x13   : > { %2583 = vmatprep.mubr.msk.f32.mxu1 %vm2846_vm0, %v2845_v2  ;;  %2611 = vmatprep.subr.mxu0 %v2845_v2  ;;  %v607_v19 = vld [vmem:[%s2905_s27 + $0x6] sm:$0xff]  ;;  %v608_v22 = vld [vmem:[%s2905_s27 + $0xe] sm:$0xff]  ;;  %v609_v23 = vld [vmem:[%s2905_s27 + $0x16] sm:$0x3f] }
  0x14   : > { %2622 = vmatprep.subr.mxu1 %v2845_v2  ;;  %2573 = vmatmul.mubr.msk.f32.gmra.mxu0 %vm234_vm1, %v2918_v7  ;;  %v886_v24 = vld [vmem:[%s2905_s27 + $0xc] sm:$0xff]  ;;  %v887_v28 = vld [vmem:[%s2905_s27 + $0x14] sm:$0xff]  ;;  %v888_v30 = vld [vmem:[%s2905_s27 + $0x1c] sm:$0x3f] }
  0x15   : > { %2584 = vmatmul.mubr.msk.f32.gmra.mxu1 %vm234_vm1, %v226_v8  ;;  %2575 = vmatprep.mubr.msk.f32.mxu0 %vm2846_vm0, %v2845_v2  ;;  %v790_v27 = vld [vmem:[%s2905_s27 + $0x10] sm:$0xff]  ;;  %v791_v29 = vld [vmem:[%s2905_s27 + $0x18] sm:$0x3f]  ;;  %v1082_v35 = vld [vmem:[%s2905_s27 + $0x1e] sm:$0x3f] }
  0x16   : > { %2586 = vmatprep.mubr.msk.f32.mxu1 %vm2846_vm0, %v2845_v2  ;;  %v983_v31 = vld [vmem:[%s2905_s27 + $0xd] sm:$0xff]  ;;  %v984_v32 = vld [vmem:[%s2905_s27 + $0x15] sm:$0xff]  ;;  %v985_v34 = vld [vmem:[%s2905_s27 + $0x1d] sm:$0x3f] }
  0x17   : > { %v1081_v33 = vld [vmem:[%s2905_s27 + $0x16] sm:$0xff]  ;;  %v1353_v37 = vld [vmem:[%s3293_s3 + $0x8] sm:$0xff]  ;;  %v1352_v39 = vld [vmem:[%s3293_s3] sm:$0xff] }
  0x18   : > { %2576 = vmatmul.mubr.msk.f32.gmra.mxu0 %vm234_vm1, %v231_v9  ;;  %v2426_v38 = vld [vmem:[%s3293_s3 + $0x10] sm:$0xff] }
  0x19   : > { %2587 = vmatmul.mubr.msk.f32.gmra.mxu1 %vm234_vm1, %v227_v10  ;;  %2591 = vmatprep.mubr.msk.f32.mxu0 %vm2846_vm0, %v2845_v2 }
  0x1a   : > { %2602 = vmatprep.mubr.msk.f32.mxu1 %vm2846_vm0, %v2845_v2 }
  0x1c   : > { %2592 = vmatmul.mubr.msk.f32.vlgmr.msra.gmra.mxu0 %vm234_vm1, %v413_v11 }
  0x1d   : > { %2603 = vmatmul.mubr.msk.f32.vlgmr.msra.gmra.mxu1 %vm234_vm1, %v510_v12  ;;  %2612 = vmatpush3.msra.mxu0 %v2401_v13 }
  0x1e   : > { %2623 = vmatpush3.msra.mxu1 %v2405_v14  ;;  %2594 = vmatprep.mubr.msk.f32.mxu0 %vm2846_vm0, %v2845_v2 }
  0x1f   : > { %2605 = vmatprep.mubr.msk.f32.mxu1 %vm2846_vm0, %v2845_v2  ;;  %2633 = vmatprep.subr.mxu0 %v2845_v2 }
  0x20   : > { %2644 = vmatprep.subr.mxu1 %v2845_v2  ;;  %2595 = vmatmul.mubr.msk.f32.gmra.mxu0 %vm234_vm1, %v414_v15 }
  0x21   : > { %2606 = vmatmul.mubr.msk.f32.gmra.mxu1 %vm234_vm1, %v511_v16  ;;  %2597 = vmatprep.mubr.msk.f32.mxu0 %vm2846_vm0, %v2845_v2 }
  0x22   : > { %2608 = vmatprep.mubr.msk.f32.mxu1 %vm2846_vm0, %v2845_v2 }
  0x24   : > { %2598 = vmatmul.mubr.msk.f32.gmra.mxu0 %vm234_vm1, %v415_v17 }
  0x25   : > { %2609 = vmatmul.mubr.msk.f32.gmra.mxu1 %vm234_vm1, %v512_v18  ;;  %2613 = vmatprep.mubr.msk.f32.mxu0 %vm2846_vm0, %v2845_v2 }
  0x26   : > { %2624 = vmatprep.mubr.msk.f32.mxu1 %vm2846_vm0, %v2845_v2 }
  0x28   : > { %2614 = vmatmul.mubr.msk.f32.vlgmr.msra.gmra.mxu0 %vm234_vm1, %v607_v19 }
  0x29   : > { %2625 = vmatmul.mubr.msk.f32.vlgmr.msra.gmra.mxu1 %vm234_vm1, %v225_v6  ;;  %2634 = vmatpush3.msra.mxu0 %v2409_v20 }
  0x2a   : > { %2645 = vmatpush3.msra.mxu1 %v2413_v21  ;;  %2616 = vmatprep.mubr.msk.f32.mxu0 %vm2846_vm0, %v2845_v2 }
  0x2b   : > { %2627 = vmatprep.mubr.msk.f32.mxu1 %vm2846_vm0, %v2845_v2  ;;  %2655 = vmatprep.subr.mxu0 %v2845_v2 }
  0x2c   : > { %2666 = vmatprep.subr.mxu1 %v2845_v2  ;;  %2617 = vmatmul.mubr.msk.f32.gmra.mxu0 %vm234_vm1, %v608_v22 }
  0x2d   : > { %2628 = vmatmul.mubr.msk.f32.gmra.mxu1 %vm234_vm1, %v226_v8  ;;  %2619 = vmatprep.mubr.msk.f32.mxu0 %vm2846_vm0, %v2845_v2 }
  0x2e   : > { %2630 = vmatprep.mubr.msk.f32.mxu1 %vm2846_vm0, %v2845_v2 }
  0x30   : > { %2620 = vmatmul.mubr.msk.f32.gmra.mxu0 %vm234_vm1, %v609_v23 }
  0x31   : > { %2631 = vmatmul.mubr.msk.f32.gmra.mxu1 %vm234_vm1, %v227_v10  ;;  %2635 = vmatprep.mubr.msk.f32.mxu0 %vm2846_vm0, %v2845_v2 }
  0x32   : > { %2646 = vmatprep.mubr.msk.f32.mxu1 %vm2846_vm0, %v2845_v2 }
  0x34   : > { %2636 = vmatmul.mubr.msk.f32.vlgmr.msra.gmra.mxu0 %vm234_vm1, %v2918_v7 }
  0x35   : > { %2647 = vmatmul.mubr.msk.f32.vlgmr.msra.gmra.mxu1 %vm234_vm1, %v886_v24  ;;  %2656 = vmatpush3.msra.mxu0 %v2417_v25 }
  0x36   : > { %2667 = vmatpush3.msra.mxu1 %v2421_v26  ;;  %2638 = vmatprep.mubr.msk.f32.mxu0 %vm2846_vm0, %v2845_v2 }
  0x37   : > { %2649 = vmatprep.mubr.msk.f32.mxu1 %vm2846_vm0, %v2845_v2  ;;  %2677 = vmatprep.subr.mxu0 %v2845_v2 }
  0x38   : > { %2690 = vmatprep.subr.mxu1 %v2845_v2  ;;  %2639 = vmatmul.mubr.msk.f32.gmra.mxu0 %vm234_vm1, %v790_v27 }
  0x39   : > { %2650 = vmatmul.mubr.msk.f32.gmra.mxu1 %vm234_vm1, %v887_v28  ;;  %2641 = vmatprep.mubr.msk.f32.mxu0 %vm2846_vm0, %v2845_v2 }
  0x3a   : > { %2652 = vmatprep.mubr.msk.f32.mxu1 %vm2846_vm0, %v2845_v2 }
  0x3c   : > { %2642 = vmatmul.mubr.msk.f32.gmra.mxu0 %vm234_vm1, %v791_v29 }
  0x3d   : > { %2653 = vmatmul.mubr.msk.f32.gmra.mxu1 %vm234_vm1, %v888_v30  ;;  %2657 = vmatprep.mubr.msk.f32.mxu0 %vm2846_vm0, %v2845_v2 }
  0x3e   : > { %2668 = vmatprep.mubr.msk.f32.mxu1 %vm2846_vm0, %v2845_v2 }
  0x40   : > { %2658 = vmatmul.mubr.msk.f32.vlgmr.msra.gmra.mxu0 %vm234_vm1, %v983_v31 }
  0x41   : > { %2669 = vmatmul.mubr.msk.f32.vlgmr.msra.gmra.mxu1 %vm234_vm1, %v608_v22  ;;  %2660 = vmatprep.mubr.msk.f32.mxu0 %vm2846_vm0, %v2845_v2 }
  0x42   : > { %2671 = vmatprep.mubr.msk.f32.mxu1 %vm2846_vm0, %v2845_v2  ;;  %2678 = vmatpush3.msra.mxu0 %v2427_v36 }
  0x43   : > { %2691 = vmatpush3.msra.mxu1 %v1353_v37  ;;  %2679 = vmatprep.subr.mxu0 %v2845_v2 }
  0x44   : > { %2661 = vmatmul.mubr.msk.f32.gmra.mxu0 %vm234_vm1, %v984_v32  ;;  %2692 = vmatprep.subr.mxu1 %v2845_v2 }
  0x45   : > { %2672 = vmatmul.mubr.msk.f32.gmra.mxu1 %vm234_vm1, %v1081_v33  ;;  %2663 = vmatprep.mubr.msk.f32.mxu0 %vm2846_vm0, %v2845_v2 }
  0x46   : > { %2674 = vmatprep.mubr.msk.f32.mxu1 %vm2846_vm0, %v2845_v2  ;;  %2680 = vmatpush3.msra.mxu0 %v2426_v38 }
  0x47   : > { %2693 = vmatpush3.msra.mxu1 %v1352_v39  ;;  %2703 = vmatprep.subr.mxu0 %v2845_v2 }
  0x48   : > { %2664 = vmatmul.mubr.msk.f32.gmra.mxu0 %vm234_vm1, %v985_v34  ;;  %2716 = vmatprep.subr.mxu1 %v2845_v2 }
  0x49   : > { %2675 = vmatmul.mubr.msk.f32.gmra.mxu1 %vm234_vm1, %v1082_v35  ;;  %2681 = vmatprep.mubr.msk.f32.mxu0 %vm2846_vm0, %v2845_v2 }
  0x4a   : > { %2694 = vmatprep.mubr.msk.f32.mxu1 %vm2846_vm0, %v2845_v2 }
  0xd0   : > { %v310_v40 = vpop.f32.mrf.mxu0 }
  0xd1   : > { %v399_v41 = vpop.f32.mrf.mxu1 }
  0xd2   : > { %v2571_v42 = vpop.f32.mrf.mxu0  ;;  %v400_v7 = vadd.f32 %v399_v41, %v310_v40 }
  0xd3   : > { %v2582_v43 = vpop.f32.mrf.mxu1 }
  0xd4   : > { %v315_v44 = vpop.f32.mrf.mxu0 }
  0xd5   : > { %v404_v45 = vpop.f32.mrf.mxu1 }
  0xd6   : > { %v2574_v46 = vpop.f32.mrf.mxu0  ;;  %v405_v13 = vadd.f32 %v404_v45, %v315_v44 }
  0xd7   : > { %v2585_v47 = vpop.f32.mrf.mxu1  ;;  %v2425_v46 = vld [vmem:[%s3292_s2] ss:$0 sm:$0xff] }
  0xd8   : > { %v320_v48 = vpop.f32.mrf.mxu0 }
  0xd9   : > { %v409_v49 = vpop.f32.mrf.mxu1 }
  0xda   : > { %v2577_v50 = vpop.f32.mrf.mxu0  ;;  %v410_v20 = vadd.f32 %v409_v49, %v320_v48 }
  0xdb   : > { %v2588_v51 = vpop.f32.mrf.mxu1 }
  0xdc   : > { %v493_v52 = vpop.f32.mrf.mxu0 }
  0xdd   : > { %v590_v53 = vpop.f32.mrf.mxu1  ;;  %v507_v10 = vadd.f32 %v493_v52, %v400_v7 }
  0xde   : > { %v2593_v54 = vpop.f32.mrf.mxu0 }
  0xdf   : > { %v2604_v55 = vpop.f32.mrf.mxu1  ;;  %v604_v16 = vadd.f32 %v590_v53, %v507_v10 }
  0xe0   : > { %v498_v56 = vpop.f32.mrf.mxu0 }
  0xe1   : > { %v595_v57 = vpop.f32.mrf.mxu1  ;;  %v508_v17 = vadd.f32 %v498_v56, %v405_v13 }
  0xe2   : > { %v2596_v58 = vpop.f32.mrf.mxu0 }
  0xe3   : > { %v2607_v59 = vpop.f32.mrf.mxu1  ;;  %v605_v24 = vadd.f32 %v595_v57, %v508_v17 }
  0xe4   : > { %v503_v60 = vpop.f32.mrf.mxu0 }
  0xe5   : > { %v600_v61 = vpop.f32.mrf.mxu1  ;;  %v509_v25 = vadd.f32 %v503_v60, %v410_v20 }
  0xe6   : > { %v2599_v62 = vpop.f32.mrf.mxu0 }
  0xe7   : > { %v2610_v63 = vpop.f32.mrf.mxu1  ;;  %v606_v32 = vadd.f32 %v600_v61, %v509_v25  ;;  %v1268_v61 = vlaneseq }
  0xe8   : > { %v687_v0 = vpop.f32.mrf.mxu0 }
  0xe9   : > { %v772_v1 = vpop.f32.mrf.mxu1  ;;  %v701_v21 = vadd.f32 %v687_v0, %v604_v16 }
  0xea   : > { %v2615_v3 = vpop.f32.mrf.mxu0 }
  0xeb   : > { %v2626_v4 = vpop.f32.mrf.mxu1  ;;  %v786_v28 = vadd.f32 %v772_v1, %v701_v21 }
  0xec   : > { %v692_v5 = vpop.f32.mrf.mxu0 }
  0xed   : > { %v777_v6 = vpop.f32.mrf.mxu1  ;;  %v702_v29 = vadd.f32 %v692_v5, %v605_v24 }
  0xee   : > { %v2618_v8 = vpop.f32.mrf.mxu0 }
  0xef   : > { %v2629_v9 = vpop.f32.mrf.mxu1  ;;  %v787_v36 = vadd.f32 %v777_v6, %v702_v29  ;;  %v1269_v8 = vshrl.u32 %v1268_v61, 7 }
  0xf0   : > { %v697_v11 = vpop.f32.mrf.mxu0 }
  0xf1   : > { %v782_v12 = vpop.f32.mrf.mxu1  ;;  %v703_v37 = vadd.f32 %v697_v11, %v606_v32  ;;  %v1270_v17 = vadd.s32 8, %v1269_v8  ;;  %v1271_v25 = vadd.s32 16, %v1269_v8 }
  0xf2   : > { %v2621_v14 = vpop.f32.mrf.mxu0 }
  0xf3   : > { %v2632_v15 = vpop.f32.mrf.mxu1  ;;  %v788_v44 = vadd.f32 %v782_v12, %v703_v37  ;;  %v1272_v14 = vadd.s32 7, %v1269_v8 }
  0xf4   : > { %v869_v18 = vpop.f32.mrf.mxu0 }
  0xf5   : > { %v966_v19 = vpop.f32.mrf.mxu1  ;;  %v883_v33 = vadd.f32 %v869_v18, %v786_v28 }
  0xf6   : > { %v2637_v22 = vpop.f32.mrf.mxu0 }
  0xf7   : > { %v2648_v23 = vpop.f32.mrf.mxu1  ;;  %v980_v40 = vadd.f32 %v966_v19, %v883_v33  ;;  %v3097_v19 = vmul.u32.u64.low 2863311531, %v1272_v14  ;;  %v3098_v20 = vmul.u32.u64.high 2863311531, %v1272_v14, %v3097_v19 }
  0xf8   : > { %v874_v26 = vpop.f32.mrf.mxu0  ;;  %v1273_v23 = vadd.s32 7, %v1270_v17 }
  0xf9   : > { %v971_v27 = vpop.f32.mrf.mxu1  ;;  %v884_v41 = vadd.f32 %v874_v26, %v787_v36  ;;  %v1281_v32 = vshrl.u32 %v3098_v20, 2 }
  0xfa   : > { %v2640_v30 = vpop.f32.mrf.mxu0  ;;  %v3100_v28 = vmul.u32.u64.low 2863311531, %v1273_v23  ;;  %v3101_v29 = vmul.u32.u64.high 2863311531, %v1273_v23, %v3100_v28 }
  0xfb   : > { %v2651_v31 = vpop.f32.mrf.mxu1  ;;  %v981_v49 = vadd.f32 %v971_v27, %v884_v41  ;;  %v1274_v30 = vadd.s32 7, %v1271_v25  ;;  %v1282_v41 = vmul.u32 6, %v1281_v32 }
  0xfc   : > { %v879_v34 = vpop.f32.mrf.mxu0 }
  0xfd   : > { %v976_v35 = vpop.f32.mrf.mxu1  ;;  %v885_v50 = vadd.f32 %v879_v34, %v788_v44 }
  0xfe   : > { %v2643_v38 = vpop.f32.mrf.mxu0 }
  0xff   : > { %v2654_v39 = vpop.f32.mrf.mxu1  ;;  %v982_v58 = vadd.f32 %v976_v35, %v885_v50 }
 0x100   : > { %v1063_v42 = vpop.f32.mrf.mxu0  ;;  %v3104_v38 = vmul.u32.u64.low 2863311531, %v1274_v30  ;;  %v3105_v39 = vmul.u32.u64.high 2863311531, %v1274_v30, %v3104_v38 }
 0x101   : > { %v1160_v43 = vpop.f32.mrf.mxu1  ;;  %v1077_v45 = vadd.f32 %v1063_v42, %v980_v40 }
 0x102   : > { %v2659_v47 = vpop.f32.mrf.mxu0 }
 0x103   : > { %v2670_v48 = vpop.f32.mrf.mxu1  ;;  %v1174_v51 = vadd.f32 %v1160_v43, %v1077_v45  ;;  %v1292_v45 = vshrl.u32 %v3101_v29, 2 }
 0x104   : > { %v1068_v52 = vpop.f32.mrf.mxu0 }
 0x105   : > { %v1165_v53 = vpop.f32.mrf.mxu1  ;;  %v3079_v54 = vadd.f32 %v2425_v46, %v1174_v51  ;;  %v1078_v55 = vadd.f32 %v1068_v52, %v981_v49  ;;  %v1283_v51 = vsub.s32 %v1272_v14, %v1282_v41 }
 0x106   : > { %v2662_v56 = vpop.f32.mrf.mxu0 }
 0x107   : > { %v2673_v57 = vpop.f32.mrf.mxu1  ;;  %v3082_v59 = vmul.f32 0.70710677, %v3079_v54  ;;  %v1175_v60 = vadd.f32 %v1165_v53, %v1078_v55  ;;  %v1293_v53 = vmul.u32 6, %v1292_v45  ;;  %vm1308_vm3 = vcmp.ne.s32.totalorder %v1283_v51, 0 }
 0x108   : > { %v1073_v62 = vpop.f32.mrf.mxu0  ;;  %vm1311_vm4 = vcmp.lt.s32.totalorder %v1283_v51, 0 }
 0x109   : > { %v1170_v63 = vpop.f32.mrf.mxu1  ;;  %v1193_v0 = vand.u32 2147483647, %v3082_v59  ;;  %v3085_v1 = vadd.f32 %v2425_v46, %v1175_v60  ;;  %v1079_v3 = vadd.f32 %v1073_v62, %v982_v58  ;;  %v1303_v60 = vshrl.u32 %v3105_v39, 2  ;;  %vm1314_vm5 = vmand %vm1311_vm4, %vm1308_vm3 }
 0x10a   : > { %v2665_v4 = vpop.f32.mrf.mxu0  ;;  %vm1253_vm12 = vcmp.lt.f32.partialorder %v3082_v59, 0.0 }
 0x10b   : > { %v2676_v5 = vpop.f32.mrf.mxu1  ;;  %v1196_v6 = vmul.f32 0.3275911, %v1193_v0  ;;  %v3088_v7 = vmul.f32 0.70710677, %v3085_v1  ;;  %v1176_v9 = vadd.f32 %v1170_v63, %v1079_v3  ;;  %v1235_v22 = vmul.f32 %v1193_v0, %v1193_v0 }
 0x10c   : > { %v1294_v0 = vsub.s32 %v1273_v23, %v1293_v53  ;;  %v1317_v5 = vadd.s32 6, %v1283_v51  ;;  %v1304_v8 = vmul.u32 6, %v1303_v60  ;;  %v2445_v60 = vld [vmem:[%s3293_s3 + $0x48] sm:$0xff] }
 0x10d   : > { %v1199_v10 = vadd.f32 1.0, %v1196_v6  ;;  %v1194_v11 = vand.u32 2147483647, %v3088_v7  ;;  %v3091_v12 = vadd.f32 %v2425_v46, %v1176_v9  ;;  %v1238_v26 = vsub.f32 0.0, %v1235_v22 }
 0x10e   : > { %vm1309_vm6 = vcmp.ne.s32.totalorder %v1294_v0, 0  ;;  %vm1312_vm7 = vcmp.lt.s32.totalorder %v1294_v0, 0  ;;  %v1320_v17 = vsel %vm1314_vm5, %v1317_v5, %v1283_v51  ;;  %v1305_v19 = vsub.s32 %v1274_v30, %v1304_v8  ;;  %v2449_v5 = vld [vmem:[%s3293_s3 + $0x50] sm:$0xff] }
 0x10f   : > { %2825 = vrcp.f32 %v1199_v10  ;;  %v1197_v13 = vmul.f32 0.3275911, %v1194_v11  ;;  %v3094_v15 = vmul.f32 0.70710677, %v3091_v12  ;;  %v1236_v27 = vmul.f32 %v1194_v11, %v1194_v11  ;;  %vm1315_vm8 = vmand %vm1312_vm7, %vm1309_vm6 }
 0x110   : > { %v1241_v34 = vmul.f32 1.442695, %v1238_v26  ;;  %v1318_v20 = vadd.s32 6, %v1294_v0  ;;  %vm1323_vm9 = vcmp.ge.s32.totalorder %v1320_v17, 1  ;;  %vm1310_vm10 = vcmp.ne.s32.totalorder %v1305_v19, 0 }
 0x111   : > { %v1200_v16 = vadd.f32 1.0, %v1197_v13  ;;  %v1195_v18 = vand.u32 2147483647, %v3094_v15  ;;  %v1239_v35 = vsub.f32 0.0, %v1236_v27  ;;  %vm1313_vm11 = vcmp.lt.s32.totalorder %v1305_v19, 0 }
 0x112   : > { %vm1326_vm13 = vcmp.lt.s32.totalorder %v1320_v17, 5  ;;  %v1321_v28 = vsel %vm1315_vm8, %v1318_v20, %v1294_v0  ;;  %v1319_v30 = vadd.s32 6, %v1305_v19  ;;  %vm1316_vm14 = vmand %vm1313_vm11, %vm1310_vm10  ;;  %vm1254_vm4 = vcmp.lt.f32.partialorder %v3088_v7, 0.0  ;;  %v2444_v0 = vld [vmem:[%s3293_s3 + $0x40] sm:$0xff] }
 0x113   : > { %2827 = vrcp.f32 %v1200_v16  ;;  %v1198_v21 = vmul.f32 0.3275911, %v1195_v18  ;;  %v1237_v36 = vmul.f32 %v1195_v18, %v1195_v18  ;;  %v1243_v44 = vmul.f32 1.442695, %v1239_v35  ;;  %vm1329_vm15 = vmand %vm1323_vm9, %vm1326_vm13 }
 0x114   : > { %vm1324_vm3 = vcmp.ge.s32.totalorder %v1321_v28, 1  ;;  %vm1327_vm5 = vcmp.lt.s32.totalorder %v1321_v28, 5  ;;  %vm1255_vm7 = vcmp.lt.f32.partialorder %v3094_v15, 0.0  ;;  %vm1347_vm11 = vcmask 128000   ;;  %v2440_v15 = vld [vmem:[%s3293_s3 + $0x38] sm:$0xff] }
 0x115   : > { %v1201_v24 = vadd.f32 1.0, %v1198_v21  ;;  %v1240_v46 = vsub.f32 0.0, %v1237_v36  ;;  %vm1330_vm6 = vmand %vm1324_vm3, %vm1327_vm5 }
 0x117   : > { %2829 = vrcp.f32 %v1201_v24  ;;  %v1245_v56 = vmul.f32 1.442695, %v1240_v46 }
 0x118   : > { %2831 = vpow2.f32 %v1241_v34 }
 0x119   : > { %2833 = vpow2.f32 %v1243_v44 }
 0x11a   : > { %2835 = vpow2.f32 %v1245_v56  ;;  %v2439_v56 = vld [vmem:[%s3293_s3 + $0x30] sm:$0xff] }
 0x11c   : > { %v2826_v31 = vpop.eup %2825 }
 0x11d   : > { %v1208_v33 = vmul.f32 1.0614054, %v2826_v31 }
 0x11f   : > { %v1211_v37 = vadd.f32 -1.4531521, %v1208_v33  ;;  %v1187_v33 = vmul.f32 0.5, %v3079_v54 }
 0x120   : > { %v2828_v40 = vpop.eup %2827 }
 0x121   : > { %v1214_v42 = vmul.f32 %v2826_v31, %v1211_v37  ;;  %v1209_v43 = vmul.f32 1.0614054, %v2828_v40 }
 0x123   : > { %v1217_v47 = vadd.f32 1.4214138, %v1214_v42  ;;  %v1212_v48 = vadd.f32 -1.4531521, %v1209_v43  ;;  %v1188_v42 = vmul.f32 0.5, %v3085_v1 }
 0x124   : > { %v2830_v49 = vpop.eup %2829 }
 0x125   : > { %v1220_v50 = vmul.f32 %v2826_v31, %v1217_v47  ;;  %v1215_v52 = vmul.f32 %v2828_v40, %v1212_v48  ;;  %v1210_v55 = vmul.f32 1.0614054, %v2830_v49  ;;  %v2832_v13 = vpop.eup %2831  ;;  %v1189_v47 = vmul.f32 0.5, %v3091_v12  ;;  %v2434_v12 = vld [vmem:[%s3293_s3 + $0x20] sm:$0xff] }
 0x126   : > { %v2834_v24 = vpop.eup %2833 }
 0x127   : > { %v1223_v57 = vadd.f32 -0.28449672, %v1220_v50  ;;  %v1218_v58 = vadd.f32 1.4214138, %v1215_v52  ;;  %v1213_v61 = vadd.f32 -1.4531521, %v1210_v55  ;;  %v2836_v36 = vpop.eup %2835 }
 0x129   : > { %v1226_v62 = vmul.f32 %v2826_v31, %v1223_v57  ;;  %v1221_v63 = vmul.f32 %v2828_v40, %v1218_v58  ;;  %v1216_v3 = vmul.f32 %v2830_v49, %v1213_v61 }
 0x12b   : > { %v1229_v4 = vadd.f32 0.2548296, %v1226_v62  ;;  %v1224_v6 = vadd.f32 -0.28449672, %v1221_v63  ;;  %v1219_v9 = vadd.f32 1.4214138, %v1216_v3 }
 0x12c   : > { %v2450_v62 = vld [vmem:[%s3293_s3 + $0x58] sm:$0xff] }
 0x12d   : > { %v1232_v10 = vmul.f32 %v2826_v31, %v1229_v4  ;;  %v1227_v11 = vmul.f32 %v2828_v40, %v1224_v6  ;;  %v1222_v14 = vmul.f32 %v2830_v49, %v1219_v9  ;;  %v2455_v9 = vld [vmem:[%s3293_s3 + $0x68] sm:$0xff] }
 0x12f   : > { %v1247_v16 = vmul.f32 %v2832_v13, %v1232_v10  ;;  %v1230_v18 = vadd.f32 0.2548296, %v1227_v11  ;;  %v1225_v21 = vadd.f32 -0.28449672, %v1222_v14  ;;  %v2460_v11 = vld [vmem:[%s3293_s3 + $0x78] sm:$0xff]  ;;  %v2454_v13 = vld [vmem:[%s3293_s3 + $0x60] sm:$0xff] }
 0x131   : > { %v1250_v22 = vsub.f32 1.0, %v1247_v16  ;;  %v1233_v23 = vmul.f32 %v2828_v40, %v1230_v18  ;;  %v1228_v25 = vmul.f32 %v2830_v49, %v1225_v21  ;;  %v1322_v40 = vsel %vm1316_vm14, %v1319_v30, %v1305_v19  ;;  %v2459_v16 = vld [vmem:[%s3293_s3 + $0x70] sm:$0xff]  ;;  %v2465_v18 = vld [vmem:[%s3293_s3 + $0x88] sm:$0xff]  ;;  %v2470_v19 = vld [vmem:[%s3293_s3 + $0x98] sm:$0xff] }
 0x132   : > { %vm1325_vm8 = vcmp.ge.s32.totalorder %v1322_v40, 1  ;;  %vm1328_vm9 = vcmp.lt.s32.totalorder %v1322_v40, 5  ;;  %v2464_v21 = vld [vmem:[%s3293_s3 + $0x80] sm:$0xff] }
 0x133   : > { %v1256_v26 = vsub.f32 0.0, %v1250_v22  ;;  %v1248_v27 = vmul.f32 %v2834_v24, %v1233_v23  ;;  %v1231_v29 = vadd.f32 0.2548296, %v1228_v25  ;;  %vm1331_vm10 = vmand %vm1325_vm8, %vm1328_vm9  ;;  %v2469_v24 = vld [vmem:[%s3293_s3 + $0x90] sm:$0xff] }
 0x135   : > { %v1259_v31 = vsel %vm1253_vm12, %v1256_v26, %v1250_v22  ;;  %v1251_v32 = vsub.f32 1.0, %v1248_v27  ;;  %v1234_v35 = vmul.f32 %v2830_v49, %v1231_v29  ;;  %v2435_v49 = vld [vmem:[%s3293_s3 + $0x28] sm:$0xff] }
 0x136   : > { %v1262_v34 = vadd.f32 1.0, %v1259_v31  ;;  %v2116_v31 = vld [vmem:[#allocation2 + $0x1d] sm:$0x3f] }
 0x137   : > { %v1257_v37 = vsub.f32 0.0, %v1251_v32  ;;  %v1249_v59 = vmul.f32 %v2836_v36, %v1234_v35 }
 0x138   : > { %v1265_v38 = vmul.f32 %v1262_v34, %v1187_v33 }
 0x139   : > { %v1260_v39 = vsel %vm1254_vm4, %v1257_v37, %v1251_v32  ;;  %v1252_v43 = vsub.f32 1.0, %v1249_v59  ;;  %v2214_v32 = vld [vmem:[#allocation2 + $0x1e] sm:$0x3f] }
 0x13a   : > { %v1338_v41 = vsel %vm1329_vm15, %v1265_v38, 0.0  ;;  %v1263_v54 = vadd.f32 1.0, %v1260_v39 }
 0x13b   : > { %1345 = vst.msk [vmem:[#allocation2 + $0x7] sm:$0xff] %vm1344_vm2, %v1338_v41  ;;  %v1258_v45 = vsub.f32 0.0, %v1252_v43 }
 0x13c   : > { %v1266_v44 = vmul.f32 %v1263_v54, %v1188_v42 }
 0x13d   : > { %v1261_v7 = vsel %vm1255_vm7, %v1258_v45, %v1252_v43 }
 0x13e   : > { %v1339_v46 = vsel %vm1330_vm6, %v1266_v44, 0.0  ;;  %v1264_v48 = vadd.f32 1.0, %v1261_v7 }
 0x13f   : > { %1346 = vst.msk [vmem:[#allocation2 + $0xf] sm:$0xff] %vm1344_vm2, %v1339_v46 }
 0x140   : > { %v1267_v1 = vmul.f32 %v1264_v48, %v1189_v47 }
 0x142   : > { %v1354_v50 = vld [vmem:[#allocation2] sm:$0xff]  ;;  %v1340_v52 = vsel %vm1331_vm10, %v1267_v1, 0.0 }
 0x143   : > { %v3124_v51 = vld [vmem:[#allocation2 + $0x7] sm:$0xff]  ;;  %2682 = vmatmul.mubr.msk.f32.vlgmr.msra.gmra.mxu0 %vm1344_vm2, %v1354_v50  ;;  %1348 = vst.msk [vmem:[#allocation2 + $0x17] sm:$0x3f] %vm1347_vm11, %v1340_v52 }
 0x144   : > { %2695 = vmatmul.mubr.msk.f32.vlgmr.msra.gmra.mxu1 %vm1344_vm2, %v3124_v51  ;;  %2704 = vmatpush3.msra.mxu0 %v2435_v49  ;;  %v1538_v61 = vld [vmem:[#allocation2 + $0x1] sm:$0xff] }
 0x145   : > { %2717 = vmatpush3.msra.mxu1 %v2440_v15  ;;  %2684 = vmatprep.mubr.msk.f32.mxu0 %vm2846_vm0, %v2845_v2  ;;  %v1636_v63 = vld [vmem:[#allocation2 + $0x2] sm:$0xff] }
 0x146   : > { %2697 = vmatprep.mubr.msk.f32.mxu1 %vm2846_vm0, %v2845_v2  ;;  %v3136_v53 = vld [vmem:[#allocation2 + $0x8] sm:$0xff]  ;;  %2705 = vmatprep.subr.mxu0 %v2845_v2  ;;  %v1356_v57 = vld [vmem:[#allocation2 + $0x10] sm:$0x3f] }
 0x147   : > { %v3138_v55 = vld [vmem:[#allocation2 + $0xf] sm:$0xff]  ;;  %2718 = vmatprep.subr.mxu1 %v2845_v2  ;;  %2685 = vmatmul.mubr.msk.f32.gmra.mxu0 %vm1344_vm2, %v3136_v53  ;;  %v1734_v10 = vld [vmem:[#allocation2 + $0x6] sm:$0xff] }
 0x148   : > { %2698 = vmatmul.mubr.msk.f32.gmra.mxu1 %vm1344_vm2, %v3138_v55  ;;  %2706 = vmatpush3.msra.mxu0 %v2434_v12  ;;  %v1539_v3 = vld [vmem:[#allocation2 + $0x9] sm:$0xff]  ;;  %v1540_v6 = vld [vmem:[#allocation2 + $0x11] sm:$0x3f] }
 0x149   : > { %2687 = vmatprep.mubr.msk.f32.mxu0 %vm2846_vm0, %v2845_v2  ;;  %2700 = vmatprep.mubr.msk.f32.mxu1 %vm2846_vm0, %v2845_v2  ;;  %v1637_v4 = vld [vmem:[#allocation2 + $0xa] sm:$0xff] }
 0x14a   : > { %2719 = vmatpush3.msra.mxu1 %v2439_v56  ;;  %2729 = vmatprep.subr.mxu0 %v2845_v2  ;;  %v1351_v58 = vld [vmem:[#allocation2 + $0x17] sm:$0x3f]  ;;  %v1735_v14 = vld [vmem:[#allocation2 + $0xe] sm:$0xff] }
 0x14b   : > { %2742 = vmatprep.subr.mxu1 %v2845_v2  ;;  %2688 = vmatmul.mubr.msk.f32.gmra.mxu0 %vm1344_vm2, %v1356_v57  ;;  %v1638_v8 = vld [vmem:[#allocation2 + $0x12] sm:$0x3f]  ;;  %v1920_v25 = vld [vmem:[#allocation2 + $0x18] sm:$0x3f] }
 0x14c   : > { %2701 = vmatmul.mubr.msk.f32.gmra.mxu1 %vm1344_vm2, %v1351_v58  ;;  %2707 = vmatprep.mubr.msk.f32.mxu0 %vm2846_vm0, %v2845_v2  ;;  %v1736_v17 = vld [vmem:[#allocation2 + $0x16] sm:$0x3f]  ;;  %v2016_v20 = vld [vmem:[#allocation2 + $0xc] sm:$0xff]  ;;  %v2018_v26 = vld [vmem:[#allocation2 + $0x1c] sm:$0x3f] }
 0x14d   : > { %2720 = vmatprep.mubr.msk.f32.mxu1 %vm2846_vm0, %v2845_v2  ;;  %v1919_v22 = vld [vmem:[#allocation2 + $0x10] sm:$0xff] }
 0x14e   : > { %v2017_v23 = vld [vmem:[#allocation2 + $0x14] sm:$0xff] }
 0x14f   : > { %2708 = vmatmul.mubr.msk.f32.vlgmr.msra.gmra.mxu0 %vm1344_vm2, %v1538_v61  ;;  %v2114_v27 = vld [vmem:[#allocation2 + $0xd] sm:$0xff]  ;;  %v2115_v28 = vld [vmem:[#allocation2 + $0x15] sm:$0xff] }
 0x150   : > { %2721 = vmatmul.mubr.msk.f32.vlgmr.msra.gmra.mxu1 %vm1344_vm2, %v1636_v63  ;;  %2730 = vmatpush3.msra.mxu0 %v2445_v60  ;;  %v2213_v29 = vld [vmem:[#allocation2 + $0x16] sm:$0xff] }
 0x151   : > { %2743 = vmatpush3.msra.mxu1 %v2450_v62  ;;  %2710 = vmatprep.mubr.msk.f32.mxu0 %vm2846_vm0, %v2845_v2 }
 0x152   : > { %2723 = vmatprep.mubr.msk.f32.mxu1 %vm2846_vm0, %v2845_v2  ;;  %2731 = vmatprep.subr.mxu0 %v2845_v2 }
 0x153   : > { %2711 = vmatmul.mubr.msk.f32.gmra.mxu0 %vm1344_vm2, %v1539_v3  ;;  %2744 = vmatprep.subr.mxu1 %v2845_v2 }
 0x154   : > { %2724 = vmatmul.mubr.msk.f32.gmra.mxu1 %vm1344_vm2, %v1637_v4  ;;  %2732 = vmatpush3.msra.mxu0 %v2444_v0 }
 0x155   : > { %2713 = vmatprep.mubr.msk.f32.mxu0 %vm2846_vm0, %v2845_v2  ;;  %2726 = vmatprep.mubr.msk.f32.mxu1 %vm2846_vm0, %v2845_v2 }
 0x156   : > { %2745 = vmatpush3.msra.mxu1 %v2449_v5  ;;  %2755 = vmatprep.subr.mxu0 %v2845_v2 }
 0x157   : > { %2714 = vmatmul.mubr.msk.f32.gmra.mxu0 %vm1344_vm2, %v1540_v6  ;;  %2768 = vmatprep.subr.mxu1 %v2845_v2 }
 0x158   : > { %2727 = vmatmul.mubr.msk.f32.gmra.mxu1 %vm1344_vm2, %v1638_v8  ;;  %2733 = vmatprep.mubr.msk.f32.mxu0 %vm2846_vm0, %v2845_v2 }
 0x159   : > { %2746 = vmatprep.mubr.msk.f32.mxu1 %vm2846_vm0, %v2845_v2 }
 0x15b   : > { %2734 = vmatmul.mubr.msk.f32.vlgmr.msra.gmra.mxu0 %vm1344_vm2, %v1734_v10 }
 0x15c   : > { %2747 = vmatmul.mubr.msk.f32.vlgmr.msra.gmra.mxu1 %vm1344_vm2, %v3124_v51  ;;  %2756 = vmatpush3.msra.mxu0 %v2455_v9 }
 0x15d   : > { %2769 = vmatpush3.msra.mxu1 %v2460_v11  ;;  %2736 = vmatprep.mubr.msk.f32.mxu0 %vm2846_vm0, %v2845_v2 }
 0x15e   : > { %2749 = vmatprep.mubr.msk.f32.mxu1 %vm2846_vm0, %v2845_v2  ;;  %2757 = vmatprep.subr.mxu0 %v2845_v2 }
 0x15f   : > { %2737 = vmatmul.mubr.msk.f32.gmra.mxu0 %vm1344_vm2, %v1735_v14  ;;  %2770 = vmatprep.subr.mxu1 %v2845_v2 }
 0x160   : > { %2750 = vmatmul.mubr.msk.f32.gmra.mxu1 %vm1344_vm2, %v3138_v55  ;;  %2758 = vmatpush3.msra.mxu0 %v2454_v13 }
 0x161   : > { %2739 = vmatprep.mubr.msk.f32.mxu0 %vm2846_vm0, %v2845_v2  ;;  %2752 = vmatprep.mubr.msk.f32.mxu1 %vm2846_vm0, %v2845_v2 }
 0x162   : > { %2771 = vmatpush3.msra.mxu1 %v2459_v16  ;;  %2781 = vmatprep.subr.mxu0 %v2845_v2 }
 0x163   : > { %2740 = vmatmul.mubr.msk.f32.gmra.mxu0 %vm1344_vm2, %v1736_v17  ;;  %2794 = vmatprep.subr.mxu1 %v2845_v2 }
 0x164   : > { %2753 = vmatmul.mubr.msk.f32.gmra.mxu1 %vm1344_vm2, %v1351_v58  ;;  %2759 = vmatprep.mubr.msk.f32.mxu0 %vm2846_vm0, %v2845_v2 }
 0x165   : > { %2772 = vmatprep.mubr.msk.f32.mxu1 %vm2846_vm0, %v2845_v2 }
 0x167   : > { %2760 = vmatmul.mubr.msk.f32.vlgmr.msra.gmra.mxu0 %vm1344_vm2, %v3136_v53 }
 0x168   : > { %2773 = vmatmul.mubr.msk.f32.vlgmr.msra.gmra.mxu1 %vm1344_vm2, %v2016_v20  ;;  %2782 = vmatpush3.msra.mxu0 %v2465_v18 }
 0x169   : > { %2795 = vmatpush3.msra.mxu1 %v2470_v19  ;;  %2762 = vmatprep.mubr.msk.f32.mxu0 %vm2846_vm0, %v2845_v2 }
 0x16a   : > { %2775 = vmatprep.mubr.msk.f32.mxu1 %vm2846_vm0, %v2845_v2  ;;  %2783 = vmatprep.subr.mxu0 %v2845_v2 }
 0x16b   : > { %2763 = vmatmul.mubr.msk.f32.gmra.mxu0 %vm1344_vm2, %v1919_v22  ;;  %2796 = vmatprep.subr.mxu1 %v2845_v2 }
 0x16c   : > { %2776 = vmatmul.mubr.msk.f32.gmra.mxu1 %vm1344_vm2, %v2017_v23  ;;  %2784 = vmatpush3.msra.mxu0 %v2464_v21 }
 0x16d   : > { %2765 = vmatprep.mubr.msk.f32.mxu0 %vm2846_vm0, %v2845_v2  ;;  %2778 = vmatprep.mubr.msk.f32.mxu1 %vm2846_vm0, %v2845_v2 }
 0x16e   : > { %2797 = vmatpush3.msra.mxu1 %v2469_v24 }
 0x16f   : > { %2766 = vmatmul.mubr.msk.f32.gmra.mxu0 %vm1344_vm2, %v1920_v25 }
 0x170   : > { %2779 = vmatmul.mubr.msk.f32.gmra.mxu1 %vm1344_vm2, %v2018_v26  ;;  %2785 = vmatprep.mubr.msk.f32.mxu0 %vm2846_vm0, %v2845_v2 }
 0x171   : > { %2798 = vmatprep.mubr.msk.f32.mxu1 %vm2846_vm0, %v2845_v2 }
 0x173   : > { %2786 = vmatmul.mubr.msk.f32.vlgmr.msra.gmra.mxu0 %vm1344_vm2, %v2114_v27 }
 0x174   : > { %2799 = vmatmul.mubr.msk.f32.vlgmr.msra.gmra.mxu1 %vm1344_vm2, %v1735_v14  ;;  %2788 = vmatprep.mubr.msk.f32.mxu0 %vm2846_vm0, %v2845_v2 }
 0x175   : > { %2801 = vmatprep.mubr.msk.f32.mxu1 %vm2846_vm0, %v2845_v2 }
 0x177   : > { %2789 = vmatmul.mubr.msk.f32.gmra.mxu0 %vm1344_vm2, %v2115_v28 }
 0x178   : > { %2802 = vmatmul.mubr.msk.f32.gmra.mxu1 %vm1344_vm2, %v2213_v29  ;;  %2791 = vmatprep.mubr.msk.f32.mxu0 %vm2846_vm0, %v2845_v2 }
 0x179   : > { %2804 = vmatprep.mubr.msk.f32.mxu1 %vm2846_vm0, %v2845_v2  ;;  %vm2322_vm0 = vcmask 62464  }
 0x17b   : > { %2792 = vmatmul.mubr.msk.f32.gmra.mxu0 %vm1344_vm2, %v2116_v31 }
 0x17c   : > { %2805 = vmatmul.mubr.msk.f32.gmra.mxu1 %vm1344_vm2, %v2214_v32 }
 0x203   : > { %v1435_v30 = vpop.f32.mrf.mxu0 }
 0x204   : > { %v1524_v33 = vpop.f32.mrf.mxu1 }
 0x205   : > { %v2683_v34 = vpop.f32.mrf.mxu0  ;;  %v1525_v55 = vadd.f32 %v1524_v33, %v1435_v30 }
 0x206   : > { %v2696_v35 = vpop.f32.mrf.mxu1 }
 0x207   : > { %v1440_v36 = vpop.f32.mrf.mxu0 }
 0x208   : > { %v1529_v37 = vpop.f32.mrf.mxu1 }
 0x209   : > { %v2686_v38 = vpop.f32.mrf.mxu0  ;;  %v1530_v62 = vadd.f32 %v1529_v37, %v1440_v36  ;;  %v2474_v37 = vld [vmem:[%s3294_s4] ss:$0 sm:$0xff] }
 0x20a   : > { %v2699_v59 = vpop.f32.mrf.mxu1 }
 0x20b   : > { %v1445_v39 = vpop.f32.mrf.mxu0 }
 0x20c   : > { %v1534_v40 = vpop.f32.mrf.mxu1 }
 0x20d   : > { %v2689_v41 = vpop.f32.mrf.mxu0  ;;  %v1535_v8 = vadd.f32 %v1534_v40, %v1445_v39 }
 0x20e   : > { %v2702_v42 = vpop.f32.mrf.mxu1 }
 0x20f   : > { %v1619_v54 = vpop.f32.mrf.mxu0 }
 0x210   : > { %v1717_v43 = vpop.f32.mrf.mxu1  ;;  %v1633_v58 = vadd.f32 %v1619_v54, %v1525_v55 }
 0x211   : > { %v2709_v2 = vpop.f32.mrf.mxu0 }
 0x212   : > { %v2722_v44 = vpop.f32.mrf.mxu1  ;;  %v1731_v3 = vadd.f32 %v1717_v43, %v1633_v58 }
 0x213   : > { %v1624_v45 = vpop.f32.mrf.mxu0 }
 0x214   : > { %v1722_v46 = vpop.f32.mrf.mxu1  ;;  %v1634_v4 = vadd.f32 %v1624_v45, %v1530_v62 }
 0x215   : > { %v2712_v7 = vpop.f32.mrf.mxu0 }
 0x216   : > { %v2725_v47 = vpop.f32.mrf.mxu1  ;;  %v1732_v13 = vadd.f32 %v1722_v46, %v1634_v4 }
 0x217   : > { %v1629_v48 = vpop.f32.mrf.mxu0 }
 0x218   : > { %v1727_v1 = vpop.f32.mrf.mxu1  ;;  %v1635_v14 = vadd.f32 %v1629_v48, %v1535_v8 }
 0x219   : > { %v2715_v49 = vpop.f32.mrf.mxu0 }
 0x21a   : > { %v2728_v15 = vpop.f32.mrf.mxu1  ;;  %v1733_v22 = vadd.f32 %v1727_v1, %v1635_v14 }
 0x21b   : > { %v1815_v50 = vpop.f32.mrf.mxu0 }
 0x21c   : > { %v1901_v51 = vpop.f32.mrf.mxu1  ;;  %v1829_v9 = vadd.f32 %v1815_v50, %v1731_v3 }
 0x21d   : > { %v2735_v52 = vpop.f32.mrf.mxu0 }
 0x21e   : > { %v2748_v12 = vpop.f32.mrf.mxu1  ;;  %v1915_v18 = vadd.f32 %v1901_v51, %v1829_v9 }
 0x21f   : > { %v1820_v53 = vpop.f32.mrf.mxu0 }
 0x220   : > { %v1906_v56 = vpop.f32.mrf.mxu1  ;;  %v1830_v19 = vadd.f32 %v1820_v53, %v1732_v13 }
 0x221   : > { %v2738_v57 = vpop.f32.mrf.mxu0 }
 0x222   : > { %v2751_v60 = vpop.f32.mrf.mxu1  ;;  %v1916_v26 = vadd.f32 %v1906_v56, %v1830_v19 }
 0x223   : > { %v1825_v61 = vpop.f32.mrf.mxu0 }
 0x224   : > { %v1911_v63 = vpop.f32.mrf.mxu1  ;;  %v1831_v27 = vadd.f32 %v1825_v61, %v1733_v22 }
 0x225   : > { %v2741_v0 = vpop.f32.mrf.mxu0 }
 0x226   : > { %v2754_v5 = vpop.f32.mrf.mxu1  ;;  %v1917_v34 = vadd.f32 %v1911_v63, %v1831_v27 }
 0x227   : > { %v1999_v6 = vpop.f32.mrf.mxu0 }
 0x228   : > { %v2097_v10 = vpop.f32.mrf.mxu1  ;;  %v2013_v23 = vadd.f32 %v1999_v6, %v1915_v18 }
 0x229   : > { %v2761_v11 = vpop.f32.mrf.mxu0 }
 0x22a   : > { %v2774_v16 = vpop.f32.mrf.mxu1  ;;  %v2111_v31 = vadd.f32 %v2097_v10, %v2013_v23 }
 0x22b   : > { %v2004_v17 = vpop.f32.mrf.mxu0 }
 0x22c   : > { %v2102_v20 = vpop.f32.mrf.mxu1  ;;  %v2014_v32 = vadd.f32 %v2004_v17, %v1916_v26 }
 0x22d   : > { %v2764_v21 = vpop.f32.mrf.mxu0 }
 0x22e   : > { %v2777_v24 = vpop.f32.mrf.mxu1  ;;  %v2112_v59 = vadd.f32 %v2102_v20, %v2014_v32 }
 0x22f   : > { %v2009_v25 = vpop.f32.mrf.mxu0 }
 0x230   : > { %v2107_v28 = vpop.f32.mrf.mxu1  ;;  %v2015_v39 = vadd.f32 %v2009_v25, %v1917_v34 }
 0x231   : > { %v2767_v29 = vpop.f32.mrf.mxu0 }
 0x232   : > { %v2780_v30 = vpop.f32.mrf.mxu1  ;;  %v2113_v45 = vadd.f32 %v2107_v28, %v2015_v39 }
 0x233   : > { %v2195_v33 = vpop.f32.mrf.mxu0 }
 0x234   : > { %v2209_v35 = vadd.f32 %v2195_v33, %v2111_v31  ;;  %v2293_v36 = vpop.f32.mrf.mxu1 }
 0x235   : > { %v2787_v38 = vpop.f32.mrf.mxu0 }
 0x236   : > { %v2307_v40 = vadd.f32 %v2293_v36, %v2209_v35  ;;  %v2800_v41 = vpop.f32.mrf.mxu1 }
 0x237   : > { %v2200_v42 = vpop.f32.mrf.mxu0 }
 0x238   : > { %v2317_v54 = vadd.f32 %v2474_v37, %v2307_v40  ;;  %v2210_v43 = vadd.f32 %v2200_v42, %v2112_v59  ;;  %v2298_v2 = vpop.f32.mrf.mxu1 }
 0x239   : > { %v2790_v44 = vpop.f32.mrf.mxu0 }
 0x23a   : > { %2320 = vst.msk [vmem:[%s224_s22] sm:$0xff] %vm234_vm1, %v2317_v54  ;;  %v2308_v46 = vadd.f32 %v2298_v2, %v2210_v43  ;;  %v2803_v7 = vpop.f32.mrf.mxu1 }
 0x23b   : > { %v2205_v47 = vpop.f32.mrf.mxu0 }
 0x23c   : > { %v2318_v48 = vadd.f32 %v2474_v37, %v2308_v46  ;;  %v2211_v1 = vadd.f32 %v2205_v47, %v2113_v45  ;;  %v2303_v49 = vpop.f32.mrf.mxu1 }
 0x23d   : > { %v2793_v15 = vpop.f32.mrf.mxu0 }
 0x23e   : > { %2321 = vst.msk [vmem:[%s224_s22 + $0x8] sm:$0xff] %vm234_vm1, %v2318_v48  ;;  %v2309_v50 = vadd.f32 %v2303_v49, %v2211_v1  ;;  %v2806_v51 = vpop.f32.mrf.mxu1 }
 0x240   : > { %v2319_v52 = vadd.f32 %v2474_v37, %v2309_v50 }
 0x242   : > { %2323 = vst.msk [vmem:[%s224_s22 + $0x10] sm:$0x3f] %vm2322_vm0, %v2319_v52 }
 0x243 PF: > { %s15_s18 = sadd.s32 1, %s2843_s18  }
 0x244   : > { %p12_p4 = scmp.ge.s32.totalorder %s15_s18, 4  }
 0x246   :  { %14 = sbr.rel (!%p12_p4) target bundleno = 1 (0x1), region = 88 }

</bundles_post_ra>
